<compile_context>
chip_gen: v5e
topology: v5e:2x2
jax: 0.10.0
libtpu: 0.0.40
codegen_flags: <defaults>
</compile_context>

<pallas_src>
import functools

import jax
import jax.numpy as jnp
from jax.experimental import pallas as pl
from jax.experimental.pallas import tpu as pltpu


def basic_block_kernel(x_ref, bw_ref, sb_ref, out_ref, *, H):
    # x_ref  : (R, W*C)         f32 activation slab; row r = b*H + y, col = x*C + c
    # bw_ref : (2, 3*W*C, W*C)  bf16 stacked banded conv weights (conv1, conv2); row blocks
    #                           [0:WC) = dy=0 (y-1) tap, [WC:2WC) = dy=1, [2WC:3WC) = dy=2 (y+1)
    # sb_ref : (8, W*C)         f32 folded-BN rows [s1, b1, s2, b2, 0, 0, 0, 0]
    # out_ref: (R, W*C)         f32
    f32, bf16 = jnp.float32, jnp.bfloat16
    x = x_ref[...]
    R = x.shape[0]

    # Per-image boundary masks (rows that have a valid y-1 / y+1 neighbour in the same image).
    row = jax.lax.broadcasted_iota(jnp.int32, x.shape, 0)
    has_up = (row % H) != 0
    has_dn = (row % H) != (H - 1)

    s1 = sb_ref[0:1, :]
    b1 = sb_ref[1:2, :]
    s2 = sb_ref[2:3, :]
    b2 = sb_ref[3:4, :]

    def conv3x3(v, band):
        # dy shifts on the XLU (roll) + VPU (mask); dx taps + W zero-padding live in `band`.
        up = jnp.where(has_up, pltpu.roll(v, 1, axis=0), 0.0)      # row y reads row y-1
        dn = jnp.where(has_dn, pltpu.roll(v, R - 1, axis=0), 0.0)  # row y reads row y+1
        k = jnp.concatenate([up, v, dn], axis=1).astype(bf16)      # (R, 3*W*C)
        return jnp.dot(k, band, preferred_element_type=f32)        # single K=3*W*C MXU dot

    # conv1 -> BN1 (folded) -> ReLU
    h1 = jnp.maximum(conv3x3(x, bw_ref[0]) * s1 + b1, 0.0)
    # conv2 -> BN2 (folded) -> residual -> ReLU
    h2 = conv3x3(h1, bw_ref[1]) * s2 + b2
    out_ref[...] = jnp.maximum(h2 + x, 0.0)


def _banded_weights(w, W, C):
    """w: (3, 3, C, C) HWIO -> (3*W*C, W*C) stacked banded matrices (one band per dy tap).

    band[dy][xi*C + ci, xo*C + co] = w[dy, xi - xo + 1, ci, co] if |xi - xo| <= 1 else 0,
    so `rowslab @ band[dy]` performs the dx sum with implicit zero padding along W.
    """
    xi = jnp.arange(W)[:, None]
    xo = jnp.arange(W)[None, :]
    dx = xi - xo + 1                                     # (W, W)
    valid = ((dx >= 0) & (dx <= 2)).astype(w.dtype)
    dx_c = jnp.clip(dx, 0, 2)
    bw = w[:, dx_c, :, :] * valid[None, :, :, None, None]  # (3, W, W, C, C) = (dy, xi, xo, ci, co)
    bw = bw.transpose(0, 1, 3, 2, 4).reshape(3 * W * C, W * C)  # rows = dy*WC + xi*C + ci
    return bw


def prepare_basic_block_params(w1, g1, be1, rm1, rv1, w2, g2, be2, rm2, rv2, *, W, eps=1e-5):
    """One-time (parameter-load-time) prep: fold BN, build banded weights, cast bands to bf16.

    Returns:
      bw: (2, 3*W*C, W*C) bf16 stacked banded conv weights.
      sb: (8, W*C) f32 packed folded-BN scale/bias rows.
    """
    C = w1.shape[-1]
    WC = W * C
    s1 = g1 / jnp.sqrt(rv1 + eps)
    b1 = be1 - rm1 * s1
    s2 = g2 / jnp.sqrt(rv2 + eps)
    b2 = be2 - rm2 * s2
    sb = jnp.zeros((8, WC), jnp.float32)
    sb = sb.at[0].set(jnp.tile(s1, W)).at[1].set(jnp.tile(b1, W))
    sb = sb.at[2].set(jnp.tile(s2, W)).at[3].set(jnp.tile(b2, W))
    bw = jnp.stack([_banded_weights(w1, W, C), _banded_weights(w2, W, C)], axis=0)
    return bw.astype(jnp.bfloat16), sb


def _use_batch_grid():
    # v7x has 2 TensorCores/chip: split the grid over batch there so both engage.
    # On single-TC chips (v5e/v6e) extra grid steps are pure overhead, so keep grid=(1,).
    try:
        return "v7" in jax.devices()[0].device_kind.lower()
    except Exception:
        return False


def task_basic_block_forward(x_nhwc, bw, sb, *, batch_parallel=None):
    """x_nhwc: (B, H, W, C) float32.  bw, sb from prepare_basic_block_params."""
    B, H, W, C = x_nhwc.shape
    BH, WC = B * H, W * C
    assert bw.shape == (2, 3 * WC, WC), bw.shape
    assert sb.shape == (8, WC), sb.shape

    if batch_parallel is None:
        batch_parallel = _use_batch_grid()
    if H % 8 != 0 or B < 2:
        batch_parallel = False
    grid_b = B if batch_parallel else 1
    rows = BH // grid_b                     # whole images per block (roll+mask is per-image)

    x2d = x_nhwc.reshape(BH, WC)            # free, contiguous reshape (no HBM pad copy)

    out2d = pl.pallas_call(
        functools.partial(basic_block_kernel, H=H),
        out_shape=jax.ShapeDtypeStruct((BH, WC), jnp.float32),
        grid_spec=pltpu.PrefetchScalarGridSpec(
            num_scalar_prefetch=0,
            grid=(grid_b,),
            in_specs=[
                pl.BlockSpec((rows, WC), lambda i: (i, 0)),           # activations
                pl.BlockSpec((2, 3 * WC, WC), lambda i: (0, 0, 0)),   # banded weights (resident)
                pl.BlockSpec((8, WC), lambda i: (0, 0)),              # folded BN scale/bias
            ],
            out_specs=pl.BlockSpec((rows, WC), lambda i: (i, 0)),
        ),
        compiler_params=pltpu.CompilerParams(dimension_semantics=("parallel",)),
    )(x2d, bw, sb)

    return out2d.reshape(B, H, W, C)


def task_basic_block(x_nhwc, w1, g1, be1, rm1, rv1, w2, g2, be2, rm2, rv2, eps=1e-5):
    """Convenience wrapper (prep + forward). Prefer hoisting prepare_* out of the hot path."""
    bw, sb = prepare_basic_block_params(w1, g1, be1, rm1, rv1, w2, g2, be2, rm2, rv2,
                                        W=x_nhwc.shape[2], eps=eps)
    return task_basic_block_forward(x_nhwc, bw, sb)


def _reference(x, w1, g1, be1, rm1, rv1, w2, g2, be2, rm2, rv2, eps=1e-5):
    """Pure-JAX NHWC reference of the BasicBlock forward (eval-mode BN)."""
    def conv(v, w):
        return jax.lax.conv_general_dilated(
            v, w, window_strides=(1, 1), padding="SAME",
            dimension_numbers=("NHWC", "HWIO", "NHWC"),
            precision=jax.lax.Precision.HIGHEST)

    def bn(v, g, be, rm, rv):
        return (v - rm) / jnp.sqrt(rv + eps) * g + be

    out = jax.nn.relu(bn(conv(x, w1), g1, be1, rm1, rv1))
    out = bn(conv(out, w2), g2, be2, rm2, rv2)
    return jax.nn.relu(out + x)


if __name__ == "__main__":
    B, C, H, W = 2, 16, 16, 16   # inplanes == planes == 16, stride=1, downsample=None
    key = jax.random.PRNGKey(0)
    ks = jax.random.split(key, 11)

    x = jax.random.normal(ks[0], (B, H, W, C), jnp.float32)          # NHWC
    w1 = jax.random.normal(ks[1], (3, 3, C, C), jnp.float32) * 0.1   # HWIO
    w2 = jax.random.normal(ks[2], (3, 3, C, C), jnp.float32) * 0.1
    g1 = 1.0 + 0.1 * jax.random.normal(ks[3], (C,), jnp.float32)
    be1 = 0.1 * jax.random.normal(ks[4], (C,), jnp.float32)
    rm1 = 0.1 * jax.random.normal(ks[5], (C,), jnp.float32)
    rv1 = 0.5 + jax.random.uniform(ks[6], (C,), jnp.float32)
    g2 = 1.0 + 0.1 * jax.random.normal(ks[7], (C,), jnp.float32)
    be2 = 0.1 * jax.random.normal(ks[8], (C,), jnp.float32)
    rm2 = 0.1 * jax.random.normal(ks[9], (C,), jnp.float32)
    rv2 = 0.5 + jax.random.uniform(ks[10], (C,), jnp.float32)

    # Hoisted, one-time parameter prep (band build + BN fold + bf16 cast).
    bw, sb = jax.block_until_ready(
        prepare_basic_block_params(w1, g1, be1, rm1, rv1, w2, g2, be2, rm2, rv2, W=W))

    out = task_basic_block_forward(x, bw, sb)
    out = jax.block_until_ready(out)

    ref = _reference(x, w1, g1, be1, rm1, rv1, w2, g2, be2, rm2, rv2)
    assert out.shape == (B, H, W, C)
    # bf16 matmul operands (band weights + activations at the MXU boundary) give ~1e-2-level
    # absolute error vs. the f32 HIGHEST-precision reference; BN/ReLU/residual remain f32.
    assert bool(jnp.allclose(out, ref, rtol=2e-2, atol=2e-2)), "mismatch vs reference"

    print("KERNEL_OK")
</pallas_src>

<mosaic_0001>
module attributes {stable_mosaic.version = 11 : i64} {
  func.func @basic_block_kernel(%arg0: i32, %arg1: memref<32x256xf32, #tpu.memory_space<vmem>>, %arg2: memref<2x768x256xbf16, #tpu.memory_space<vmem>>, %arg3: memref<8x256xf32, #tpu.memory_space<vmem>>, %arg4: memref<32x256xf32, #tpu.memory_space<vmem>>) attributes {dimension_semantics = [#tpu.dimension_semantics<parallel>], iteration_bounds = array<i64: 1>, scalar_prefetch = 0 : i64, scratch_operands = 0 : i64, tpu.core_type = #tpu.core_type<tc>, window_params = [{transform_indices = @transform_0, window_bounds = array<i64: 32, 256>}, {pipeline_mode = #tpu.pipeline_mode<synchronous>, transform_indices = @transform_1, window_bounds = array<i64: 2, 768, 256>}, {pipeline_mode = #tpu.pipeline_mode<synchronous>, transform_indices = @transform_2, window_bounds = array<i64: 8, 256>}, {transform_indices = @transform_3, window_bounds = array<i64: 32, 256>}]} {
    %c0 = arith.constant 0 : index
    %c0_0 = arith.constant 0 : index
    %0 = vector.load %arg1[%c0, %c0_0] : memref<32x256xf32, #tpu.memory_space<vmem>>, vector<32x256xf32>
    %1 = tpu.iota {dimensions = array<i32: 0>} : vector<32x256xi32>
    %c16_i32 = arith.constant 16 : i32
    %c0_i32 = arith.constant 0 : i32
    %2 = arith.cmpi eq, %c16_i32, %c0_i32 : i32
    %c1_i32 = arith.constant 1 : i32
    %3 = arith.select %2, %c1_i32, %c16_i32 : i32
    %4 = vector.broadcast %3 : i32 to vector<32x256xi32>
    %5 = arith.remsi %1, %4 : vector<32x256xi32>
    %c0_i32_1 = arith.constant 0 : i32
    %6 = vector.broadcast %c0_i32_1 : i32 to vector<32x256xi32>
    %7 = arith.cmpi ne, %5, %6 : vector<32x256xi32>
    %c0_i32_2 = arith.constant 0 : i32
    %8 = vector.broadcast %c0_i32_2 : i32 to vector<32x256xi32>
    %9 = arith.cmpi slt, %5, %8 : vector<32x256xi32>
    %c0_i32_3 = arith.constant 0 : i32
    %10 = arith.cmpi slt, %3, %c0_i32_3 : i32
    %11 = vector.broadcast %10 : i1 to vector<32x256xi1>
    %12 = vector.broadcast %11 : vector<32x256xi1> to vector<32x256xi1>
    %13 = arith.xori %9, %12 : vector<32x256xi1>
    %14 = arith.andi %13, %7 : vector<32x256xi1>
    %15 = vector.broadcast %3 : i32 to vector<32x256xi32>
    %16 = arith.addi %5, %15 : vector<32x256xi32>
    %17 = arith.select %14, %16, %5 : vector<32x256xi1>, vector<32x256xi32>
    %c0_i32_4 = arith.constant 0 : i32
    %18 = vector.broadcast %c0_i32_4 : i32 to vector<32x256xi32>
    %19 = arith.cmpi ne, %17, %18 : vector<32x256xi32>
    %c16_i32_5 = arith.constant 16 : i32
    %c0_i32_6 = arith.constant 0 : i32
    %20 = arith.cmpi eq, %c16_i32_5, %c0_i32_6 : i32
    %c1_i32_7 = arith.constant 1 : i32
    %21 = arith.select %20, %c1_i32_7, %c16_i32_5 : i32
    %22 = vector.broadcast %21 : i32 to vector<32x256xi32>
    %23 = arith.remsi %1, %22 : vector<32x256xi32>
    %c0_i32_8 = arith.constant 0 : i32
    %24 = vector.broadcast %c0_i32_8 : i32 to vector<32x256xi32>
    %25 = arith.cmpi ne, %23, %24 : vector<32x256xi32>
    %c0_i32_9 = arith.constant 0 : i32
    %26 = vector.broadcast %c0_i32_9 : i32 to vector<32x256xi32>
    %27 = arith.cmpi slt, %23, %26 : vector<32x256xi32>
    %c0_i32_10 = arith.constant 0 : i32
    %28 = arith.cmpi slt, %21, %c0_i32_10 : i32
    %29 = vector.broadcast %28 : i1 to vector<32x256xi1>
    %30 = vector.broadcast %29 : vector<32x256xi1> to vector<32x256xi1>
    %31 = arith.xori %27, %30 : vector<32x256xi1>
    %32 = arith.andi %31, %25 : vector<32x256xi1>
    %33 = vector.broadcast %21 : i32 to vector<32x256xi32>
    %34 = arith.addi %23, %33 : vector<32x256xi32>
    %35 = arith.select %32, %34, %23 : vector<32x256xi1>, vector<32x256xi32>
    %c15_i32 = arith.constant 15 : i32
    %36 = vector.broadcast %c15_i32 : i32 to vector<32x256xi32>
    %37 = arith.cmpi ne, %35, %36 : vector<32x256xi32>
    %c0_11 = arith.constant 0 : index
    %c0_12 = arith.constant 0 : index
    %38 = vector.load %arg3[%c0_11, %c0_12] : memref<8x256xf32, #tpu.memory_space<vmem>>, vector<1x256xf32>
    %c1 = arith.constant 1 : index
    %c0_13 = arith.constant 0 : index
    %39 = vector.load %arg3[%c1, %c0_13] : memref<8x256xf32, #tpu.memory_space<vmem>>, vector<1x256xf32>
    %c2 = arith.constant 2 : index
    %c0_14 = arith.constant 0 : index
    %40 = vector.load %arg3[%c2, %c0_14] : memref<8x256xf32, #tpu.memory_space<vmem>>, vector<1x256xf32>
    %c3 = arith.constant 3 : index
    %c0_15 = arith.constant 0 : index
    %41 = vector.load %arg3[%c3, %c0_15] : memref<8x256xf32, #tpu.memory_space<vmem>>, vector<1x256xf32>
    %c0_16 = arith.constant 0 : index
    %c0_17 = arith.constant 0 : index
    %c0_18 = arith.constant 0 : index
    %42 = vector.load %arg2[%c0_16, %c0_17, %c0_18] : memref<2x768x256xbf16, #tpu.memory_space<vmem>>, vector<1x768x256xbf16>
    %43 = vector.shape_cast %42 : vector<1x768x256xbf16> to vector<768x256xbf16>
    %c1_i32_19 = arith.constant 1 : i32
    %44 = tpu.dynamic_rotate %0 by %c1_i32_19 dim 0 : vector<32x256xf32>, i32 -> vector<32x256xf32>
    %cst = arith.constant 0.000000e+00 : f32
    %45 = vector.broadcast %cst : f32 to vector<32x256xf32>
    %46 = arith.select %19, %44, %45 : vector<32x256xi1>, vector<32x256xf32>
    %c31_i32 = arith.constant 31 : i32
    %47 = tpu.dynamic_rotate %0 by %c31_i32 dim 0 : vector<32x256xf32>, i32 -> vector<32x256xf32>
    %cst_20 = arith.constant 0.000000e+00 : f32
    %48 = vector.broadcast %cst_20 : f32 to vector<32x256xf32>
    %49 = arith.select %37, %47, %48 : vector<32x256xi1>, vector<32x256xf32>
    %50 = tpu.concatenate %46, %0, %49 in 1 : vector<32x256xf32>, vector<32x256xf32>, vector<32x256xf32> -> vector<32x768xf32>
    %51 = arith.truncf %50 : vector<32x768xf32> to vector<32x768xbf16>
    %cst_21 = arith.constant dense<0.000000e+00> : vector<32x256xf32>
    %52 = tpu.matmul %51, %43, %cst_21 {dimension_numbers = #tpu.dot_dimension_numbers<[1], [0], [0], [1], [0, 0, 1, 1], [], []>} : vector<32x768xbf16>, vector<768x256xbf16>, vector<32x256xf32> -> vector<32x256xf32>
    %53 = vector.broadcast %38 : vector<1x256xf32> to vector<32x256xf32>
    %54 = arith.mulf %52, %53 : vector<32x256xf32>
    %55 = vector.broadcast %39 : vector<1x256xf32> to vector<32x256xf32>
    %56 = arith.addf %54, %55 : vector<32x256xf32>
    %cst_22 = arith.constant 0.000000e+00 : f32
    %57 = vector.broadcast %cst_22 : f32 to vector<32x256xf32>
    %58 = arith.maximumf %56, %57 : vector<32x256xf32>
    %c1_23 = arith.constant 1 : index
    %c0_24 = arith.constant 0 : index
    %c0_25 = arith.constant 0 : index
    %59 = vector.load %arg2[%c1_23, %c0_24, %c0_25] : memref<2x768x256xbf16, #tpu.memory_space<vmem>>, vector<1x768x256xbf16>
    %60 = vector.shape_cast %59 : vector<1x768x256xbf16> to vector<768x256xbf16>
    %c1_i32_26 = arith.constant 1 : i32
    %61 = tpu.dynamic_rotate %58 by %c1_i32_26 dim 0 : vector<32x256xf32>, i32 -> vector<32x256xf32>
    %cst_27 = arith.constant 0.000000e+00 : f32
    %62 = vector.broadcast %cst_27 : f32 to vector<32x256xf32>
    %63 = arith.select %19, %61, %62 : vector<32x256xi1>, vector<32x256xf32>
    %c31_i32_28 = arith.constant 31 : i32
    %64 = tpu.dynamic_rotate %58 by %c31_i32_28 dim 0 : vector<32x256xf32>, i32 -> vector<32x256xf32>
    %cst_29 = arith.constant 0.000000e+00 : f32
    %65 = vector.broadcast %cst_29 : f32 to vector<32x256xf32>
    %66 = arith.select %37, %64, %65 : vector<32x256xi1>, vector<32x256xf32>
    %67 = tpu.concatenate %63, %58, %66 in 1 : vector<32x256xf32>, vector<32x256xf32>, vector<32x256xf32> -> vector<32x768xf32>
    %68 = arith.truncf %67 : vector<32x768xf32> to vector<32x768xbf16>
    %cst_30 = arith.constant dense<0.000000e+00> : vector<32x256xf32>
    %69 = tpu.matmul %68, %60, %cst_30 {dimension_numbers = #tpu.dot_dimension_numbers<[1], [0], [0], [1], [0, 0, 1, 1], [], []>} : vector<32x768xbf16>, vector<768x256xbf16>, vector<32x256xf32> -> vector<32x256xf32>
    %70 = vector.broadcast %40 : vector<1x256xf32> to vector<32x256xf32>
    %71 = arith.mulf %69, %70 : vector<32x256xf32>
    %72 = vector.broadcast %41 : vector<1x256xf32> to vector<32x256xf32>
    %73 = arith.addf %71, %72 : vector<32x256xf32>
    %74 = arith.addf %73, %0 : vector<32x256xf32>
    %cst_31 = arith.constant 0.000000e+00 : f32
    %75 = vector.broadcast %cst_31 : f32 to vector<32x256xf32>
    %76 = arith.maximumf %74, %75 : vector<32x256xf32>
    %c0_32 = arith.constant 0 : index
    %c0_33 = arith.constant 0 : index
    %77 = vector.load %arg4[%c0_32, %c0_33] : memref<32x256xf32, #tpu.memory_space<vmem>>, vector<32x256xf32>
    tpu.vector_store %arg4[%c0_32, %c0_33], %76 {strides = array<i32>} : memref<32x256xf32, #tpu.memory_space<vmem>>, vector<32x256xf32>,
    return
  }
  func.func @transform_0(%arg0: i32) -> (i32, i32) {
    %c0_i32 = arith.constant 0 : i32
    %c0_i32_0 = arith.constant 0 : i32
    return %arg0, %c0_i32 : i32, i32
  }
  func.func @transform_1(%arg0: i32) -> (i32, i32, i32) {
    %c0_i32 = arith.constant 0 : i32
    %c0_i32_0 = arith.constant 0 : i32
    %c0_i32_1 = arith.constant 0 : i32
    %c0_i32_2 = arith.constant 0 : i32
    return %c0_i32, %c0_i32_0, %c0_i32_1 : i32, i32, i32
  }
  func.func @transform_2(%arg0: i32) -> (i32, i32) {
    %c0_i32 = arith.constant 0 : i32
    %c0_i32_0 = arith.constant 0 : i32
    %c0_i32_1 = arith.constant 0 : i32
    return %c0_i32, %c0_i32_0 : i32, i32
  }
  func.func @transform_3(%arg0: i32) -> (i32, i32) {
    %c0_i32 = arith.constant 0 : i32
    %c0_i32_0 = arith.constant 0 : i32
    return %arg0, %c0_i32 : i32, i32
  }
}

</mosaic_0001>

<bundles_post_ra>
// kernel: tpu_custom_call.1
= control target key start
LH: loop header
LB: loop body
LE: loop exit
PB: predicated region body
PF: predicated region fallthrough
CT: control target
= control target key end

     0   :  { %8 = vsyncpa [#allocation3], 0  ;;  %s3671_s0 = inlined_call_operand.hbm [shape: f32[32,256], index: 0, kind: input, shape index: {}]   ;;  %s3672_s1 = inlined_call_operand.hbm [shape: bf16[2,768,256], index: 1, kind: input, shape index: {}]   ;;  %s3673_s2 = inlined_call_operand.hbm [shape: f32[8,256], index: 2, kind: input, shape index: {}]   ;;  %s3674_s3 = inlined_call_operand.hbm [shape: f32[32,256], index: 3, kind: output, shape index: {}]  }
   0x1   :  { %9 = vsyncpa [#allocation6], 0  ;;  %s28_s14 = sshll.u32 %s3672_s1, 4  ;;  %s29_s14 = int_to_ptr.hbm [resolvable:$true] %s28_s14 }
   0x2   :  { %10 = vsyncpa [#allocation4], 0  ;;  %s3146_s15 = smov [#allocation5]   ;;  %s15_s19 = sshll.u32 %s3671_s0, 4  ;;  %s16_s19 = int_to_ptr.hbm [resolvable:$true] %s15_s19 }
   0x3   :  { %s30_s16 = sshll.u32 %s3146_s15, 4  ;;  %s3147_s20 = smov 128   ;;  %s31_s16 = int_to_ptr.vmem [resolvable:$true] %s30_s16 }
   0x4   :  { %s3148_s21 = smov 8   ;;  %s3149_s22 = smov [#allocation2]  }
   0x5   :  { %36 = dma.hbm_to_vmem [thread:$0]  %s29_s14, 24576, %s31_s16, [#allocation6], %s3147_s20, %s3147_s20, %s3148_s21  }
   0x6   :  { %s17_s23 = sshll.u32 %s3149_s22, 4  ;;  %s3150_s24 = smov 256   ;;  %s18_s23 = int_to_ptr.vmem [resolvable:$true] %s17_s23 }
   0x7   :  { %s3151_s25 = smov 16   ;;  %s42_s27 = sshll.u32 %s3673_s2, 4  ;;  %s43_s27 = int_to_ptr.hbm [resolvable:$true] %s42_s27 }
   0x8   :  { %23 = dma.hbm_to_vmem [thread:$0]  %s16_s19, 1024, %s18_s23, [#allocation3], %s3150_s24, %s3150_s24, %s3151_s25  }
   0x9   :  { %s3152_s28 = smov [#allocation7]  }
   0xa   :  { %s44_s0 = sshll.u32 %s3152_s28, 4  ;;  %s45_s0 = int_to_ptr.vmem [resolvable:$true] %s44_s0 }
   0xb   :  { %47 = dma.hbm_to_vmem [thread:$0]  %s43_s27, 256, %s45_s0, [#allocation6]  }
   0xc   :  { %3140 = dma.done.wait [#allocation3], 1024  }
   0xd   :  { %3141 = vsyncadd [#allocation3], 4294966272 }
   0xe   :  { %3142 = dma.done.wait [#allocation6], 24832  }
   0xf   :  { %3143 = vsyncadd [#allocation6], 4294942464  ;;  %v2029_v0 = vld [vmem:[#allocation5 + $0x70] sm:$0xf]  ;;  %v2850_v1 = vld [vmem:[#allocation5 + $0x74] sm:$0xf0]  ;;  %v68_v45 = vlaneseq }
  0x10   :  { %v2093_v2 = vld [vmem:[#allocation5 + $0xf0] sm:$0xf]  ;;  %v2030_v3 = vor.u32 %v2850_v1, %v2029_v0  ;;  %v2866_v4 = vld [vmem:[#allocation5 + $0xf4] sm:$0xf0]  ;;  %v2021_v11 = vld [vmem:[#allocation5 + $0x60] sm:$0xf] }
  0x11   :  { %v2157_v5 = vld [vmem:[#allocation5 + $0x170] sm:$0xf]  ;;  %v2882_v6 = vld [vmem:[#allocation5 + $0x174] sm:$0xf0]  ;;  %v2094_v7 = vor.u32 %v2866_v4, %v2093_v2  ;;  %v2848_v13 = vld [vmem:[#allocation5 + $0x64] sm:$0xf0] }
  0x12   :  { %v2158_v8 = vor.u32 %v2882_v6, %v2157_v5  ;;  %v2221_v9 = vld [vmem:[#allocation5 + $0x1f0] sm:$0xf]  ;;  %v2898_v10 = vld [vmem:[#allocation5 + $0x1f4] sm:$0xf0]  ;;  %774 = vmatpush.bf16.msra.mxu0 %v2030_v3  ;;  %v2085_v14 = vld [vmem:[#allocation5 + $0xe0] sm:$0xf]  ;;  %v2022_v16 = vor.u32 %v2848_v13, %v2021_v11 }
  0x13   :  { %v2222_v12 = vor.u32 %v2898_v10, %v2221_v9  ;;  %v2864_v15 = vld [vmem:[#allocation5 + $0xe4] sm:$0xf0]  ;;  %793 = vmatpush.bf16.msra.mxu1 %v2094_v7  ;;  %v2149_v18 = vld [vmem:[#allocation5 + $0x160] sm:$0xf]  ;;  %v2013_v23 = vld [vmem:[#allocation5 + $0x50] sm:$0xf] }
  0x14   :  { %812 = vmatpush.bf16.msra.mxu2 %v2158_v8  ;;  %v2086_v17 = vor.u32 %v2864_v15, %v2085_v14  ;;  %v2880_v19 = vld [vmem:[#allocation5 + $0x164] sm:$0xf0]  ;;  %v2213_v20 = vld [vmem:[#allocation5 + $0x1e0] sm:$0xf]  ;;  %v2846_v24 = vld [vmem:[#allocation5 + $0x54] sm:$0xf0] }
  0x15   :  { %831 = vmatpush.bf16.msra.mxu3 %v2222_v12  ;;  %v2150_v21 = vor.u32 %v2880_v19, %v2149_v18  ;;  %v2896_v22 = vld [vmem:[#allocation5 + $0x1e4] sm:$0xf0]  ;;  %v2077_v26 = vld [vmem:[#allocation5 + $0xd0] sm:$0xf]  ;;  %v2862_v27 = vld [vmem:[#allocation5 + $0xd4] sm:$0xf0]  ;;  %v2014_v29 = vor.u32 %v2846_v24, %v2013_v23 }
  0x16   :  { %v2214_v25 = vor.u32 %v2896_v22, %v2213_v20  ;;  %v2141_v28 = vld [vmem:[#allocation5 + $0x150] sm:$0xf]  ;;  %775 = vmatpush.bf16.msra.mxu0 %v2022_v16  ;;  %v2878_v30 = vld [vmem:[#allocation5 + $0x154] sm:$0xf0]  ;;  %v2078_v33 = vor.u32 %v2862_v27, %v2077_v26  ;;  %v2005_v35 = vld [vmem:[#allocation5 + $0x40] sm:$0xf] }
  0x17   :  { %v2205_v31 = vld [vmem:[#allocation5 + $0x1d0] sm:$0xf]  ;;  %v2894_v32 = vld [vmem:[#allocation5 + $0x1d4] sm:$0xf0]  ;;  %794 = vmatpush.bf16.msra.mxu1 %v2086_v17  ;;  %v2142_v34 = vor.u32 %v2878_v30, %v2141_v28  ;;  %v2844_v36 = vld [vmem:[#allocation5 + $0x44] sm:$0xf0] }
  0x18   :  { %813 = vmatpush.bf16.msra.mxu2 %v2150_v21  ;;  %v2069_v37 = vld [vmem:[#allocation5 + $0xc0] sm:$0xf]  ;;  %v2206_v38 = vor.u32 %v2894_v32, %v2205_v31  ;;  %v2860_v39 = vld [vmem:[#allocation5 + $0xc4] sm:$0xf0]  ;;  %v2006_v44 = vor.u32 %v2844_v36, %v2005_v35  ;;  %v1997_v48 = vld [vmem:[#allocation5 + $0x30] sm:$0xf] }
  0x19   :  { %832 = vmatpush.bf16.msra.mxu3 %v2214_v25  ;;  %v2133_v40 = vld [vmem:[#allocation5 + $0x140] sm:$0xf]  ;;  %v2876_v41 = vld [vmem:[#allocation5 + $0x144] sm:$0xf0]  ;;  %v2070_v46 = vor.u32 %v2860_v39, %v2069_v37  ;;  %v2842_v49 = vld [vmem:[#allocation5 + $0x34] sm:$0xf0] }
  0x1a   :  { %v2197_v42 = vld [vmem:[#allocation5 + $0x1c0] sm:$0xf]  ;;  %v2892_v43 = vld [vmem:[#allocation5 + $0x1c4] sm:$0xf0]  ;;  %776 = vmatpush.bf16.msra.mxu0 %v2014_v29  ;;  %v2134_v47 = vor.u32 %v2876_v41, %v2133_v40  ;;  %v2061_v50 = vld [vmem:[#allocation5 + $0xb0] sm:$0xf]  ;;  %v1998_v57 = vor.u32 %v2842_v49, %v1997_v48 }
  0x1b   :  { %795 = vmatpush.bf16.msra.mxu1 %v2078_v33  ;;  %v2198_v51 = vor.u32 %v2892_v43, %v2197_v42  ;;  %v2858_v52 = vld [vmem:[#allocation5 + $0xb4] sm:$0xf0]  ;;  %v2125_v53 = vld [vmem:[#allocation5 + $0x130] sm:$0xf]  ;;  %v1989_v58 = vld [vmem:[#allocation5 + $0x20] sm:$0xf] }
  0x1c   :  { %814 = vmatpush.bf16.msra.mxu2 %v2142_v34  ;;  %v2874_v54 = vld [vmem:[#allocation5 + $0x134] sm:$0xf0]  ;;  %v2189_v55 = vld [vmem:[#allocation5 + $0x1b0] sm:$0xf]  ;;  %v2840_v59 = vld [vmem:[#allocation5 + $0x24] sm:$0xf0]  ;;  %v2062_v61 = vor.u32 %v2858_v52, %v2061_v50 }
  0x1d   :  { %833 = vmatpush.bf16.msra.mxu3 %v2206_v38  ;;  %v2890_v56 = vld [vmem:[#allocation5 + $0x1b4] sm:$0xf0]  ;;  %v3187_v60 = vshrl.u32 %v68_v45, 7  ;;  %v2126_v62 = vor.u32 %v2874_v54, %v2125_v53  ;;  %v2053_v63 = vld [vmem:[#allocation5 + $0xa0] sm:$0xf]  ;;  %v1990_v9 = vor.u32 %v2840_v59, %v1989_v58  ;;  %v3191_v21 = vld [vmem:[#allocation2 + $0x10] sm:$0xff] }
  0x1e   :  { %777 = vmatpush.bf16.msra.mxu0 %v2006_v44  ;;  %v2856_v0 = vld [vmem:[#allocation5 + $0xa4] sm:$0xf0]  ;;  %v2117_v1 = vld [vmem:[#allocation5 + $0x120] sm:$0xf]  ;;  %v2190_v2 = vor.u32 %v2890_v56, %v2189_v55  ;;  %v1981_v6 = vld [vmem:[#allocation5 + $0x10] sm:$0xf] }
  0x1f   :  { %796 = vmatpush.bf16.msra.mxu1 %v2070_v46  ;;  %v2872_v3 = vld [vmem:[#allocation5 + $0x124] sm:$0xf0]  ;;  %v2181_v4 = vld [vmem:[#allocation5 + $0x1a0] sm:$0xf]  ;;  %v2838_v7 = vld [vmem:[#allocation5 + $0x14] sm:$0xf0]  ;;  %v2054_v13 = vor.u32 %v2856_v0, %v2053_v63 }
  0x20   :  { %815 = vmatpush.bf16.msra.mxu2 %v2134_v47  ;;  %v2888_v5 = vld [vmem:[#allocation5 + $0x1a4] sm:$0xf0]  ;;  %v2045_v8 = vld [vmem:[#allocation5 + $0x90] sm:$0xf]  ;;  %v2854_v10 = vld [vmem:[#allocation5 + $0x94] sm:$0xf0]  ;;  %v2118_v14 = vor.u32 %v2872_v3, %v2117_v1  ;;  %v1982_v22 = vor.u32 %v2838_v7, %v1981_v6 }
  0x21   :  { %834 = vmatpush.bf16.msra.mxu3 %v2198_v51  ;;  %v2109_v11 = vld [vmem:[#allocation5 + $0x110] sm:$0xf]  ;;  %v2870_v12 = vld [vmem:[#allocation5 + $0x114] sm:$0xf0]  ;;  %v2182_v17 = vor.u32 %v2888_v5, %v2181_v4  ;;  %v1973_v18 = vld [vmem:[#allocation5] sm:$0xf]  ;;  %v2046_v23 = vor.u32 %v2854_v10, %v2045_v8 }
  0x22   :  { %778 = vmatpush.bf16.msra.mxu0 %v1998_v57  ;;  %v2173_v15 = vld [vmem:[#allocation5 + $0x190] sm:$0xf]  ;;  %v2886_v16 = vld [vmem:[#allocation5 + $0x194] sm:$0xf0]  ;;  %v2836_v19 = vld [vmem:[#allocation5 + $0x4] sm:$0xf0]  ;;  %v2110_v24 = vor.u32 %v2870_v12, %v2109_v11 }
  0x23   :  { %797 = vmatpush.bf16.msra.mxu1 %v2062_v61  ;;  %v3189_v20 = vld [vmem:[#allocation2] sm:$0xff]  ;;  %v2852_v26 = vld [vmem:[#allocation5 + $0x84] sm:$0xf0]  ;;  %v3193_v28 = vld [vmem:[#allocation2 + $0x30] sm:$0xff]  ;;  %v77_v31 = vand.u32 15, %v3187_v60  ;;  %v234_v33 = vrot.slane %v3191_v21, 7  ;;  %v2174_v40 = vor.u32 %v2886_v16, %v2173_v15  ;;  %v1974_v42 = vor.u32 %v2836_v19, %v1973_v18 }
  0x24   :  { %816 = vmatpush.bf16.msra.mxu2 %v2126_v62  ;;  %v2037_v25 = vld [vmem:[#allocation5 + $0x80] sm:$0xf]  ;;  %v3195_v29 = vld [vmem:[#allocation2 + $0x8] sm:$0xff]  ;;  %v3197_v30 = vld [vmem:[#allocation2 + $0x18] sm:$0xff]  ;;  %v232_v32 = vrot.slane %v3189_v20, 7  ;;  %v238_v34 = vrot.slane %v3193_v28, 7  ;;  %v3242_v4 = vpack.c.bf16 %v3191_v21, %v3189_v20 }
  0x25   :  { %835 = vmatpush.bf16.msra.mxu3 %v2190_v2  ;;  %v2101_v27 = vld [vmem:[#allocation5 + $0x100] sm:$0xf]  ;;  %v3203_v35 = vld [vmem:[#allocation2 + $0x38] sm:$0xff]  ;;  %v2868_v36 = vld [vmem:[#allocation5 + $0x104] sm:$0xf0]  ;;  %vm240_vm0 = vcmp.lt.s32.totalorder %v3187_v60, 1  ;;  %v2038_v46 = vor.u32 %v2852_v26, %v2037_v25  ;;  %v3246_v7 = vpack.c.bf16 %v3197_v30, %v3195_v29 }
  0x26   :  { %779 = vmatpush.bf16.msra.mxu0 %v1990_v9  ;;  %v233_v37 = vrot.slane %v3195_v29, 7  ;;  %v235_v38 = vrot.slane %v3197_v30, 7  ;;  %v239_v39 = vrot.slane %v3203_v35, 7  ;;  %v2165_v41 = vld [vmem:[#allocation5 + $0x180] sm:$0xf]  ;;  %v2102_v47 = vor.u32 %v2868_v36, %v2101_v27  ;;  %v3259_v36 = vld [vmem:[#allocation2 + $0x28] sm:$0xff] }
  0x27   :  { %798 = vmatpush.bf16.msra.mxu1 %v2054_v13  ;;  %v2884_v43 = vld [vmem:[#allocation5 + $0x184] sm:$0xf0]  ;;  %v2849_v44 = vld [vmem:[#allocation5 + $0x74] sm:$0xf]  ;;  %v2031_v45 = vld [vmem:[#allocation5 + $0x78] sm:$0xf0]  ;;  %v245_v48 = vsel %vm240_vm0, %v232_v32, %v234_v33  ;;  %v247_v49 = vsel %vm240_vm0, %v238_v34, %v232_v32 }
  0x28   :  { %817 = vmatpush.bf16.msra.mxu2 %v2118_v14  ;;  %v2349_v50 = vld [vmem:[#allocation5 + $0x2f0] sm:$0xf]  ;;  %v2930_v51 = vld [vmem:[#allocation5 + $0x2f4] sm:$0xf0]  ;;  %vm3217_vm1 = vcmp.ne.s32.totalorder %v77_v31, 0  ;;  %v246_v53 = vsel %vm240_vm0, %v233_v37, %v235_v38  ;;  %v248_v54 = vsel %vm240_vm0, %v239_v39, %v233_v37  ;;  %v2166_v55 = vor.u32 %v2884_v43, %v2165_v41  ;;  %s3154_s2 = smov [#allocation8]  }
  0x29   :  { %836 = vmatpush.bf16.msra.mxu3 %v2182_v17  ;;  %v2034_v56 = vor.u32 %v2849_v44, %v2031_v45  ;;  %v2285_v57 = vld [vmem:[#allocation5 + $0x270] sm:$0xf]  ;;  %v2914_v58 = vld [vmem:[#allocation5 + $0x274] sm:$0xf0]  ;;  %v2865_v59 = vld [vmem:[#allocation5 + $0xf4] sm:$0xf]  ;;  %v3229_v61 = vpack.c.bf16 %v245_v48, %v247_v49  ;;  %v2350_v62 = vor.u32 %v2930_v51, %v2349_v50  ;;  %v3238_v3 = vpack.c.bf16 %v246_v53, %v248_v54 }
  0x2a   :  { %780 = vmatpush.bf16.msra.mxu0 %v1982_v22  ;;  %v2095_v63 = vld [vmem:[#allocation5 + $0xf8] sm:$0xf0]  ;;  %v2847_v0 = vld [vmem:[#allocation5 + $0x64] sm:$0xf]  ;;  %v2023_v1 = vld [vmem:[#allocation5 + $0x68] sm:$0xf0]  ;;  %v2286_v8 = vor.u32 %v2914_v58, %v2285_v57 }
  0x2b   :  { %799 = vmatpush.bf16.msra.mxu1 %v2046_v23  ;;  %vm3153_vm2 = vmmov 1   ;;  %v2341_v5 = vld [vmem:[#allocation5 + $0x2e0] sm:$0xf]  ;;  %v2928_v6 = vld [vmem:[#allocation5 + $0x2e4] sm:$0xf0]  ;;  %v2098_v9 = vor.u32 %v2865_v59, %v2095_v63  ;;  %v2026_v10 = vor.u32 %v2847_v0, %v2023_v1  ;;  %v71_v25 = vadd.s32 16, %v3187_v60 }
  0x2c   :  { %818 = vmatpush.bf16.msra.mxu2 %v2110_v24  ;;  %vm3234_vm3 = vmpackc.low %vm3153_vm2, %vm3217_vm1  ;;  %v2277_v11 = vld [vmem:[#allocation5 + $0x260] sm:$0xf]  ;;  %v2912_v12 = vld [vmem:[#allocation5 + $0x264] sm:$0xf0]  ;;  %v2342_v14 = vor.u32 %v2928_v6, %v2341_v5  ;;  %v237_v48 = vrot.slane %v3259_v36, 7  ;;  %vm265_vm6 = vcmp.lt.s32.totalorder %v3187_v60, 7 }
  0x2d   :  { %837 = vmatpush.bf16.msra.mxu3 %v2174_v40  ;;  %v2863_v13 = vld [vmem:[#allocation5 + $0xe4] sm:$0xf]  ;;  %v2087_v15 = vld [vmem:[#allocation5 + $0xe8] sm:$0xf0]  ;;  %v2845_v16 = vld [vmem:[#allocation5 + $0x54] sm:$0xf]  ;;  %v2278_v22 = vor.u32 %v2912_v12, %v2277_v11 }
  0x2e   :  { %781 = vmatpush.bf16.msra.mxu0 %v1974_v42  ;;  %v2015_v17 = vld [vmem:[#allocation5 + $0x58] sm:$0xf0]  ;;  %v2333_v18 = vld [vmem:[#allocation5 + $0x2d0] sm:$0xf]  ;;  %v2926_v19 = vld [vmem:[#allocation5 + $0x2d4] sm:$0xf0]  ;;  %v2090_v26 = vor.u32 %v2863_v13, %v2087_v15  ;;  %v242_v5 = vsel %vm240_vm0, %v237_v48, %v239_v39 }
  0x2f   :  { %800 = vmatpush.bf16.msra.mxu1 %v2038_v46  ;;  %v2269_v23 = vld [vmem:[#allocation5 + $0x250] sm:$0xf]  ;;  %v3256_v24 = vld [vmem:[#allocation2 + $0x20] sm:$0xff]  ;;  %v2018_v27 = vor.u32 %v2845_v16, %v2015_v17  ;;  %v2910_v31 = vld [vmem:[#allocation5 + $0x254] sm:$0xf0]  ;;  %v2334_v37 = vor.u32 %v2926_v19, %v2333_v18  ;;  %v3300_v19 = vpack.c.bf16 %v3203_v35, %v3259_v36  ;;  %s1955_s29 = sshll.u32 %s3154_s2, 4  ;;  %s1956_s29 = int_to_ptr.vmem [resolvable:$true] %s1955_s29 }
  0x30   :  { %819 = vmatpush.bf16.msra.mxu2 %v2102_v47  ;;  %v2861_v32 = vld [vmem:[#allocation5 + $0xd4] sm:$0xf]  ;;  %v2079_v40 = vld [vmem:[#allocation5 + $0xd8] sm:$0xf0]  ;;  %v2843_v41 = vld [vmem:[#allocation5 + $0x44] sm:$0xf]  ;;  %v2270_v46 = vor.u32 %v2910_v31, %v2269_v23  ;;  %v3296_v16 = vpack.c.bf16 %v3193_v28, %v3256_v24 }
  0x31   :  { %838 = vmatpush.bf16.msra.mxu3 %v2166_v55  ;;  %2357 = vmatmul.msk.bf16.vlgmr.msra.gmra.mxu0 %vm3234_vm3, %v3229_v61  ;;  %v2007_v42 = vld [vmem:[#allocation5 + $0x48] sm:$0xf0]  ;;  %v2325_v43 = vld [vmem:[#allocation5 + $0x2c0] sm:$0xf]  ;;  %v2924_v44 = vld [vmem:[#allocation5 + $0x2c4] sm:$0xf0]  ;;  %v2082_v49 = vor.u32 %v2861_v32, %v2079_v40 }
  0x32   :  { %2363 = vmatmul.msk.bf16.vlgmr.msra.gmra.mxu1 %vm3234_vm3, %v3238_v3  ;;  %850 = vmatpush.bf16.msrb.mxu0 %v2286_v8  ;;  %v236_v45 = vrot.slane %v3256_v24, 7  ;;  %v91_v47 = vand.u32 15, %v71_v25  ;;  %v2010_v50 = vor.u32 %v2843_v41, %v2007_v42  ;;  %v2261_v51 = vld [vmem:[#allocation5 + $0x240] sm:$0xf]  ;;  %v2908_v52 = vld [vmem:[#allocation5 + $0x244] sm:$0xf0]  ;;  %v2326_v54 = vor.u32 %v2924_v44, %v2325_v43 }
  0x33   :  { %869 = vmatpush.bf16.msrb.mxu1 %v2350_v62  ;;  %820 = vmatmul.bf16.vlgmr.msra.gmra.mxu2 %v3242_v4  ;;  %v2859_v53 = vld [vmem:[#allocation5 + $0xc4] sm:$0xf]  ;;  %v2071_v55 = vld [vmem:[#allocation5 + $0xc8] sm:$0xf0]  ;;  %v1999_v57 = vld [vmem:[#allocation5 + $0x38] sm:$0xf0]  ;;  %v2262_v0 = vor.u32 %v2908_v52, %v2261_v51 }
  0x34   :  { %888 = vmatpush.bf16.msrb.mxu2 %v2034_v56  ;;  %839 = vmatmul.bf16.vlgmr.msra.gmra.mxu3 %v3246_v7  ;;  %v2841_v56 = vld [vmem:[#allocation5 + $0x34] sm:$0xf]  ;;  %v241_v58 = vsel %vm240_vm0, %v236_v45, %v238_v34  ;;  %v243_v59 = vsel %vm240_vm0, %v234_v33, %v236_v45  ;;  %v2317_v62 = vld [vmem:[#allocation5 + $0x2b0] sm:$0xf]  ;;  %v2922_v63 = vld [vmem:[#allocation5 + $0x2b4] sm:$0xf0]  ;;  %v244_v34 = vsel %vm240_vm0, %v235_v38, %v237_v48 }
  0x35   :  { %907 = vmatpush.bf16.msrb.mxu3 %v2098_v9  ;;  %vm3271_vm4 = vcmp.ne.s32.totalorder %v91_v47, 0  ;;  %v2074_v33 = vor.u32 %v2859_v53, %v2071_v55  ;;  %v2002_v6 = vor.u32 %v2841_v56, %v1999_v57  ;;  %v2253_v8 = vld [vmem:[#allocation5 + $0x230] sm:$0xf]  ;;  %v2906_v9 = vld [vmem:[#allocation5 + $0x234] sm:$0xf0]  ;;  %v3283_v11 = vpack.c.bf16 %v241_v58, %v243_v59  ;;  %s1957_s5 = sshll.u32 %s3674_s3, 4  ;;  %s1958_s5 = int_to_ptr.hbm [resolvable:$true] %s1957_s5 }
  0x36   :  { %851 = vmatpush.bf16.msrb.mxu0 %v2278_v22  ;;  %v2318_v12 = vor.u32 %v2922_v63, %v2317_v62  ;;  %v2063_v13 = vld [vmem:[#allocation5 + $0xb8] sm:$0xf0]  ;;  %v1991_v15 = vld [vmem:[#allocation5 + $0x28] sm:$0xf0]  ;;  %vm3288_vm5 = vmpackc.low %vm3153_vm2, %vm3271_vm4  ;;  %v3292_v38 = vpack.c.bf16 %v242_v5, %v244_v34  ;;  %v2254_v22 = vor.u32 %v2906_v9, %v2253_v8  ;;  %v70_v44 = vadd.s32 8, %v3187_v60 }
  0x37   :  { %870 = vmatpush.bf16.msrb.mxu1 %v2342_v14  ;;  %v2839_v14 = vld [vmem:[#allocation5 + $0x24] sm:$0xf]  ;;  %v2309_v17 = vld [vmem:[#allocation5 + $0x2a0] sm:$0xf]  ;;  %v2920_v18 = vld [vmem:[#allocation5 + $0x2a4] sm:$0xf0] }
  0x38   :  { %889 = vmatpush.bf16.msrb.mxu2 %v2026_v10  ;;  %v2857_v10 = vld [vmem:[#allocation5 + $0xb4] sm:$0xf]  ;;  %v1994_v25 = vor.u32 %v2839_v14, %v1991_v15  ;;  %v2855_v31 = vld [vmem:[#allocation5 + $0xa4] sm:$0xf]  ;;  %v2310_v32 = vor.u32 %v2920_v18, %v2309_v17  ;;  %v1983_v41 = vld [vmem:[#allocation5 + $0x18] sm:$0xf0] }
  0x39   :  { %908 = vmatpush.bf16.msrb.mxu3 %v2090_v26  ;;  %v2066_v23 = vor.u32 %v2857_v10, %v2063_v13  ;;  %v2245_v26 = vld [vmem:[#allocation5 + $0x220] sm:$0xf]  ;;  %v2837_v40 = vld [vmem:[#allocation5 + $0x14] sm:$0xf]  ;;  %v2301_v42 = vld [vmem:[#allocation5 + $0x290] sm:$0xf] }
  0x3a   :  { %852 = vmatpush.bf16.msrb.mxu0 %v2270_v46  ;;  %v2918_v43 = vld [vmem:[#allocation5 + $0x294] sm:$0xf0]  ;;  %v2237_v46 = vld [vmem:[#allocation5 + $0x210] sm:$0xf]  ;;  %v2853_v48 = vld [vmem:[#allocation5 + $0x94] sm:$0xf] }
  0x3b   :  { %871 = vmatpush.bf16.msrb.mxu1 %v2334_v37  ;;  %v2055_v37 = vld [vmem:[#allocation5 + $0xa8] sm:$0xf0]  ;;  %v2902_v47 = vld [vmem:[#allocation5 + $0x214] sm:$0xf0]  ;;  %v2047_v51 = vld [vmem:[#allocation5 + $0x98] sm:$0xf0] }
  0x3c   :  { %890 = vmatpush.bf16.msrb.mxu2 %v2018_v27  ;;  %v2904_v27 = vld [vmem:[#allocation5 + $0x224] sm:$0xf0]  ;;  %v2835_v52 = vld [vmem:[#allocation5 + $0x4] sm:$0xf]  ;;  %v1975_v53 = vld [vmem:[#allocation5 + $0x8] sm:$0xf0]  ;;  %v2238_v34 = vor.u32 %v2902_v47, %v2237_v46  ;;  %v2050_v10 = vor.u32 %v2853_v48, %v2047_v51 }
  0x3d   :  { %909 = vmatpush.bf16.msrb.mxu3 %v2082_v49  ;;  %v2246_v45 = vor.u32 %v2904_v27, %v2245_v26  ;;  %v2058_v49 = vor.u32 %v2855_v31, %v2055_v37  ;;  %v2229_v55 = vld [vmem:[#allocation5 + $0x200] sm:$0xf]  ;;  %v2900_v56 = vld [vmem:[#allocation5 + $0x204] sm:$0xf0]  ;;  %v257_v59 = vrot.slane %v3189_v20, 1  ;;  %v259_v62 = vrot.slane %v3191_v21, 1 }
  0x3e   :  { %853 = vmatpush.bf16.msrb.mxu0 %v2262_v0  ;;  %v2293_v57 = vld [vmem:[#allocation5 + $0x280] sm:$0xf]  ;;  %v2916_v58 = vld [vmem:[#allocation5 + $0x284] sm:$0xf0]  ;;  %v261_v63 = vrot.slane %v3256_v24, 1  ;;  %v258_v0 = vrot.slane %v3195_v29, 1  ;;  %v1978_v21 = vor.u32 %v2835_v52, %v1975_v53 }
  0x3f   :  { %872 = vmatpush.bf16.msrb.mxu1 %v2326_v54  ;;  %v2302_v54 = vor.u32 %v2918_v43, %v2301_v42  ;;  %v2913_v1 = vld [vmem:[#allocation5 + $0x274] sm:$0xf]  ;;  %v2287_v5 = vld [vmem:[#allocation5 + $0x278] sm:$0xf0]  ;;  %v2039_v13 = vld [vmem:[#allocation5 + $0x88] sm:$0xf0]  ;;  %v2294_v15 = vor.u32 %v2916_v58, %v2293_v57  ;;  %v270_v37 = vsel %vm265_vm6, %v257_v59, %v259_v62 }
  0x40   :  { %891 = vmatpush.bf16.msrb.mxu2 %v2010_v50  ;;  %v1986_v50 = vor.u32 %v2837_v40, %v1983_v41  ;;  %v2897_v8 = vld [vmem:[#allocation5 + $0x1f4] sm:$0xf]  ;;  %v2223_v9 = vld [vmem:[#allocation5 + $0x1f8] sm:$0xf0]  ;;  %v84_v14 = vand.u32 15, %v70_v44  ;;  %v2290_v17 = vor.u32 %v2913_v1, %v2287_v5 }
  0x41   :  { %910 = vmatpush.bf16.msrb.mxu3 %v2074_v33  ;;  %2360 = vmatmul.msk.bf16.gmra.mxu0 %vm3288_vm5, %v3283_v11  ;;  %v260_v33 = vrot.slane %v3197_v30, 1  ;;  %v2881_v18 = vld [vmem:[#allocation5 + $0x174] sm:$0xf]  ;;  %v2230_v30 = vor.u32 %v2900_v56, %v2229_v55  ;;  %v2351_v26 = vld [vmem:[#allocation5 + $0x2f8] sm:$0xf0] }
  0x42   :  { %2366 = vmatmul.msk.bf16.gmra.mxu1 %vm3288_vm5, %v3292_v38  ;;  %854 = vmatpush.bf16.msrb.mxu0 %v2254_v22  ;;  %v2159_v22 = vld [vmem:[#allocation5 + $0x178] sm:$0xf0]  ;;  %v2911_v27 = vld [vmem:[#allocation5 + $0x264] sm:$0xf]  ;;  %v2279_v31 = vld [vmem:[#allocation5 + $0x268] sm:$0xf0] }
  0x43   :  { %873 = vmatpush.bf16.msrb.mxu1 %v2318_v12  ;;  %825 = vmatmul.bf16.gmra.mxu2 %v3296_v16  ;;  %v2851_v12 = vld [vmem:[#allocation5 + $0x84] sm:$0xf]  ;;  %v271_v41 = vsel %vm265_vm6, %v258_v0, %v260_v33  ;;  %vm3334_vm7 = vcmp.ne.s32.totalorder %v84_v14, 15  ;;  %v2162_v44 = vor.u32 %v2881_v18, %v2159_v22  ;;  %v2151_v46 = vld [vmem:[#allocation5 + $0x168] sm:$0xf0]  ;;  %v2282_v48 = vor.u32 %v2911_v27, %v2279_v31 }
  0x44   :  { %892 = vmatpush.bf16.msrb.mxu2 %v2002_v6  ;;  %844 = vmatmul.bf16.gmra.mxu3 %v3300_v19  ;;  %v262_v6 = vrot.slane %v3259_v36, 1  ;;  %v2042_v42 = vor.u32 %v2851_v12, %v2039_v13  ;;  %v2927_v51 = vld [vmem:[#allocation5 + $0x2e4] sm:$0xf]  ;;  %v2909_v55 = vld [vmem:[#allocation5 + $0x254] sm:$0xf]  ;;  %vm3345_vm8 = vmpackc.low %vm3334_vm7, %vm3153_vm2  ;;  %v72_v22 = vadd.s32 24, %v3187_v60 }
  0x45   :  { %911 = vmatpush.bf16.msrb.mxu3 %v2066_v23  ;;  %v2929_v23 = vld [vmem:[#allocation5 + $0x2f4] sm:$0xf]  ;;  %v2271_v56 = vld [vmem:[#allocation5 + $0x258] sm:$0xf0]  ;;  %v2907_v12 = vld [vmem:[#allocation5 + $0x244] sm:$0xf] }
  0x46   :  { %855 = vmatpush.bf16.msrb.mxu0 %v2246_v45  ;;  %v269_v40 = vsel %vm265_vm6, %v260_v33, %v262_v6  ;;  %v2879_v45 = vld [vmem:[#allocation5 + $0x164] sm:$0xf]  ;;  %v2354_v47 = vor.u32 %v2929_v23, %v2351_v26  ;;  %v2877_v1 = vld [vmem:[#allocation5 + $0x154] sm:$0xf]  ;;  %v2143_v5 = vld [vmem:[#allocation5 + $0x158] sm:$0xf0]  ;;  %v2274_v33 = vor.u32 %v2909_v55, %v2271_v56 }
  0x47   :  { %874 = vmatpush.bf16.msrb.mxu1 %v2310_v32  ;;  %v268_v32 = vsel %vm265_vm6, %v259_v62, %v261_v63  ;;  %v3340_v53 = vpack.c.bf16 %v269_v40, %v271_v41  ;;  %v2154_v58 = vor.u32 %v2879_v45, %v2151_v46  ;;  %v2263_v13 = vld [vmem:[#allocation5 + $0x248] sm:$0xf0]  ;;  %v2146_v14 = vor.u32 %v2877_v1, %v2143_v5  ;;  %v2923_v27 = vld [vmem:[#allocation5 + $0x2c4] sm:$0xf]  ;;  %v2905_v31 = vld [vmem:[#allocation5 + $0x234] sm:$0xf] }
  0x48   :  { %893 = vmatpush.bf16.msrb.mxu2 %v1994_v25  ;;  %v2226_v25 = vor.u32 %v2897_v8, %v2223_v9  ;;  %v3338_v52 = vpack.c.bf16 %v268_v32, %v270_v37  ;;  %v2893_v8 = vld [vmem:[#allocation5 + $0x1d4] sm:$0xf]  ;;  %v2207_v9 = vld [vmem:[#allocation5 + $0x1d8] sm:$0xf0]  ;;  %v2135_v18 = vld [vmem:[#allocation5 + $0x148] sm:$0xf0] }
  0x49   :  { %912 = vmatpush.bf16.msrb.mxu3 %v2058_v49  ;;  %v2895_v49 = vld [vmem:[#allocation5 + $0x1e4] sm:$0xf]  ;;  %v2199_v26 = vld [vmem:[#allocation5 + $0x1c8] sm:$0xf0]  ;;  %v2255_v32 = vld [vmem:[#allocation5 + $0x238] sm:$0xf0] }
  0x4a   :  { %856 = vmatpush.bf16.msrb.mxu0 %v2238_v34  ;;  %v264_v37 = vrot.slane %v3203_v35, 1  ;;  %v2873_v43 = vld [vmem:[#allocation5 + $0x134] sm:$0xf]  ;;  %v2258_v46 = vor.u32 %v2905_v31, %v2255_v32  ;;  %v2183_v1 = vld [vmem:[#allocation5 + $0x1a8] sm:$0xf0] }
  0x4b   :  { %875 = vmatpush.bf16.msrb.mxu1 %v2302_v54  ;;  %v2343_v54 = vld [vmem:[#allocation5 + $0x2e8] sm:$0xf0]  ;;  %v2919_v29 = vld [vmem:[#allocation5 + $0x2a4] sm:$0xf]  ;;  %v2607_v2 = vld [vmem:[#allocation5 + $0x498] sm:$0xf0] }
  0x4c   :  { %894 = vmatpush.bf16.msrb.mxu2 %v1986_v50  ;;  %v2215_v50 = vld [vmem:[#allocation5 + $0x1e8] sm:$0xf0]  ;;  %v2346_v34 = vor.u32 %v2927_v51, %v2343_v54  ;;  %v2903_v51 = vld [vmem:[#allocation5 + $0x224] sm:$0xf]  ;;  %v267_v55 = vsel %vm265_vm6, %v262_v6, %v264_v37  ;;  %v273_v56 = vsel %vm265_vm6, %v264_v37, %v258_v0 }
  0x4d   :  { %913 = vmatpush.bf16.msrb.mxu3 %v2050_v10  ;;  %v2218_v62 = vor.u32 %v2895_v49, %v2215_v50  ;;  %v2925_v10 = vld [vmem:[#allocation5 + $0x2d4] sm:$0xf]  ;;  %v2319_v50 = vld [vmem:[#allocation5 + $0x2b8] sm:$0xf0]  ;;  %v2247_v54 = vld [vmem:[#allocation5 + $0x228] sm:$0xf0] }
  0x4e   :  { %857 = vmatpush.bf16.msrb.mxu0 %v2230_v30  ;;  %v2266_v30 = vor.u32 %v2907_v12, %v2263_v13  ;;  %v2921_v49 = vld [vmem:[#allocation5 + $0x2b4] sm:$0xf]  ;;  %v2887_v6 = vld [vmem:[#allocation5 + $0x1a4] sm:$0xf]  ;;  %v2311_v0 = vld [vmem:[#allocation5 + $0x2a8] sm:$0xf0] }
  0x4f   :  { %876 = vmatpush.bf16.msrb.mxu1 %v2294_v15  ;;  %v2210_v15 = vor.u32 %v2893_v8, %v2207_v9  ;;  %v2322_v36 = vor.u32 %v2921_v49, %v2319_v50  ;;  %v2239_v8 = vld [vmem:[#allocation5 + $0x218] sm:$0xf0]  ;;  %v2869_v12 = vld [vmem:[#allocation5 + $0x114] sm:$0xf]  ;;  %v2883_v37 = vld [vmem:[#allocation5 + $0x184] sm:$0xf] }
  0x50   :  { %895 = vmatpush.bf16.msrb.mxu2 %v1978_v21  ;;  %v2335_v21 = vld [vmem:[#allocation5 + $0x2d8] sm:$0xf0]  ;;  %v2565_v49 = vld [vmem:[#allocation5 + $0x440] sm:$0xf]  ;;  %v2972_v50 = vld [vmem:[#allocation5 + $0x444] sm:$0xf0] }
  0x51   :  { %914 = vmatpush.bf16.msrb.mxu3 %v2042_v42  ;;  %2369 = vmatmul.msk.bf16.vlgmr.msrb.gmra.mxu0 %vm3345_vm8, %v3338_v52  ;;  %v2338_v23 = vor.u32 %v2925_v10, %v2335_v21  ;;  %v98_v42 = vand.u32 15, %v72_v22  ;;  %v2186_v21 = vor.u32 %v2887_v6, %v2183_v1  ;;  %v2111_v13 = vld [vmem:[#allocation5 + $0x118] sm:$0xf0]  ;;  %v2917_v22 = vld [vmem:[#allocation5 + $0x294] sm:$0xf] }
  0x52   :  { %926 = vmatpush.bf16.msra.mxu0 %v2162_v44  ;;  %2375 = vmatmul.msk.bf16.vlgmr.msrb.gmra.mxu1 %vm3345_vm8, %v3340_v53  ;;  %v2127_v44 = vld [vmem:[#allocation5 + $0x138] sm:$0xf0]  ;;  %v2453_v1 = vld [vmem:[#allocation5 + $0x360] sm:$0xf] }
  0x53   :  { %945 = vmatpush.bf16.msra.mxu1 %v2226_v25  ;;  %2381 = vmatmul.msk.bf16.vlgmr.msrb.gmra.mxu2 %vm3234_vm3, %v3229_v61  ;;  %v2891_v25 = vld [vmem:[#allocation5 + $0x1c4] sm:$0xf]  ;;  %v2327_v61 = vld [vmem:[#allocation5 + $0x2c8] sm:$0xf0]  ;;  %vm3380_vm9 = vcmp.ne.s32.totalorder %v98_v42, 15  ;;  %v2130_v20 = vor.u32 %v2873_v43, %v2127_v44 }
  0x54   :  { %964 = vmatpush.bf16.msra.mxu2 %v2290_v17  ;;  %2387 = vmatmul.msk.bf16.vlgmr.msrb.gmra.mxu3 %vm3234_vm3, %v3238_v3  ;;  %v2875_v17 = vld [vmem:[#allocation5 + $0x144] sm:$0xf]  ;;  %v263_v3 = vrot.slane %v3193_v28, 1  ;;  %v2202_v41 = vor.u32 %v2891_v25, %v2199_v26  ;;  %v2330_v45 = vor.u32 %v2923_v27, %v2327_v61  ;;  %vm3387_vm10 = vmpackc.low %vm3380_vm9, %vm3153_vm2  ;;  %v2231_v25 = vld [vmem:[#allocation5 + $0x208] sm:$0xf0]  ;;  %v2114_v26 = vor.u32 %v2869_v12, %v2111_v13 }
  0x55   :  { %983 = vmatpush.bf16.msra.mxu3 %v2354_v47  ;;  %v2138_v40 = vor.u32 %v2875_v17, %v2135_v18  ;;  %v2889_v47 = vld [vmem:[#allocation5 + $0x1b4] sm:$0xf]  ;;  %v2175_v18 = vld [vmem:[#allocation5 + $0x198] sm:$0xf0]  ;;  %v2867_v61 = vld [vmem:[#allocation5 + $0x104] sm:$0xf] }
  0x56   :  { %927 = vmatpush.bf16.msra.mxu0 %v2154_v58  ;;  %v266_v28 = vsel %vm265_vm6, %v261_v63, %v263_v3  ;;  %v272_v35 = vsel %vm265_vm6, %v263_v3, %v257_v59  ;;  %v2871_v58 = vld [vmem:[#allocation5 + $0x124] sm:$0xf]  ;;  %v2119_v59 = vld [vmem:[#allocation5 + $0x128] sm:$0xf0]  ;;  %v2885_v17 = vld [vmem:[#allocation5 + $0x194] sm:$0xf] }
  0x57   :  { %946 = vmatpush.bf16.msra.mxu1 %v2218_v62  ;;  %v2250_v62 = vor.u32 %v2903_v51, %v2247_v54  ;;  %v2371_v5 = vpack.c.bf16 %v272_v35, %v266_v28  ;;  %v2122_v10 = vor.u32 %v2871_v58, %v2119_v59  ;;  %v2178_v27 = vor.u32 %v2885_v17, %v2175_v18  ;;  %v2103_v3 = vld [vmem:[#allocation5 + $0x108] sm:$0xf0]  ;;  %v2557_v54 = vld [vmem:[#allocation5 + $0x430] sm:$0xf]  ;;  %v2970_v28 = vld [vmem:[#allocation5 + $0x434] sm:$0xf0] }
  0x58   :  { %965 = vmatpush.bf16.msra.mxu2 %v2282_v48  ;;  %v2191_v48 = vld [vmem:[#allocation5 + $0x1b8] sm:$0xf0]  ;;  %v2295_v42 = vld [vmem:[#allocation5 + $0x288] sm:$0xf0]  ;;  %v2566_v51 = vor.u32 %v2972_v50, %v2565_v49  ;;  %v2558_v35 = vor.u32 %v2970_v28, %v2557_v54  ;;  %v2445_v12 = vld [vmem:[#allocation5 + $0x350] sm:$0xf] }
  0x59   :  { %984 = vmatpush.bf16.msra.mxu3 %v2346_v34  ;;  %v2194_v63 = vor.u32 %v2889_v47, %v2191_v48  ;;  %v2377_v34 = vpack.c.bf16 %v273_v56, %v267_v55  ;;  %v2573_v47 = vld [vmem:[#allocation5 + $0x450] sm:$0xf]  ;;  %v2942_v13 = vld [vmem:[#allocation5 + $0x354] sm:$0xf0]  ;;  %v2533_v17 = vld [vmem:[#allocation5 + $0x400] sm:$0xf] }
  0x5a   :  { %928 = vmatpush.bf16.msra.mxu0 %v2146_v14  ;;  %v2314_v14 = vor.u32 %v2919_v29, %v2311_v0  ;;  %v2944_v29 = vld [vmem:[#allocation5 + $0x364] sm:$0xf0]  ;;  %v2966_v0 = vld [vmem:[#allocation5 + $0x414] sm:$0xf0]  ;;  %v2447_v49 = vld [vmem:[#allocation5 + $0x358] sm:$0xf0] }
  0x5b   :  { %947 = vmatpush.bf16.msra.mxu1 %v2210_v15  ;;  %v2964_v18 = vld [vmem:[#allocation5 + $0x404] sm:$0xf0]  ;;  %v2645_v54 = vld [vmem:[#allocation5 + $0x4e0] sm:$0xf] }
  0x5c   :  { %966 = vmatpush.bf16.msra.mxu2 %v2274_v33  ;;  %v2901_v33 = vld [vmem:[#allocation5 + $0x214] sm:$0xf]  ;;  %v2992_v28 = vld [vmem:[#allocation5 + $0x4e4] sm:$0xf0] }
  0x5d   :  { %985 = vmatpush.bf16.msra.mxu3 %v2338_v23  ;;  %v2242_v15 = vor.u32 %v2901_v33, %v2239_v8  ;;  %v2303_v23 = vld [vmem:[#allocation5 + $0x298] sm:$0xf0] }
  0x5e   :  { %929 = vmatpush.bf16.msra.mxu0 %v2138_v40  ;;  %v2306_v31 = vor.u32 %v2917_v22, %v2303_v23  ;;  %v2167_v40 = vld [vmem:[#allocation5 + $0x188] sm:$0xf0]  ;;  %v2534_v22 = vor.u32 %v2964_v18, %v2533_v17  ;;  %v2437_v23 = vld [vmem:[#allocation5 + $0x340] sm:$0xf]  ;;  %v2937_v18 = vld [vmem:[#allocation5 + $0x334] sm:$0xf] }
  0x5f   :  { %948 = vmatpush.bf16.msra.mxu1 %v2202_v41  ;;  %v2915_v41 = vld [vmem:[#allocation5 + $0x284] sm:$0xf]  ;;  %v2170_v43 = vor.u32 %v2883_v37, %v2167_v40  ;;  %v2429_v37 = vld [vmem:[#allocation5 + $0x330] sm:$0xf]  ;;  %v2938_v40 = vld [vmem:[#allocation5 + $0x334] sm:$0xf0] }
  0x60   :  { %967 = vmatpush.bf16.msra.mxu2 %v2266_v30  ;;  %v2899_v30 = vld [vmem:[#allocation5 + $0x204] sm:$0xf] }
  0x61   :  { %986 = vmatpush.bf16.msra.mxu3 %v2330_v45  ;;  %2372 = vmatmul.msk.bf16.gmra.mxu0 %vm3387_vm10, %v2371_v5  ;;  %v2234_v32 = vor.u32 %v2899_v30, %v2231_v25  ;;  %v2581_v45 = vld [vmem:[#allocation5 + $0x460] sm:$0xf]  ;;  %v2940_v30 = vld [vmem:[#allocation5 + $0x344] sm:$0xf0] }
  0x62   :  { %930 = vmatpush.bf16.msra.mxu0 %v2130_v20  ;;  %2378 = vmatmul.msk.bf16.gmra.mxu1 %vm3387_vm10, %v2377_v34  ;;  %v2461_v20 = vld [vmem:[#allocation5 + $0x370] sm:$0xf]  ;;  %v2438_v25 = vor.u32 %v2940_v30, %v2437_v23  ;;  %v3447_v23 = vld [vmem:[#allocation7 + $0x1] ss:$8 sm:$0x3] }
  0x63   :  { %949 = vmatpush.bf16.msra.mxu1 %v2194_v63  ;;  %2384 = vmatmul.msk.bf16.gmra.mxu2 %vm3288_vm5, %v3283_v11  ;;  %v2106_v11 = vor.u32 %v2867_v61, %v2103_v3  ;;  %v2946_v63 = vld [vmem:[#allocation5 + $0x374] sm:$0xf0] }
  0x64   :  { %968 = vmatpush.bf16.msra.mxu2 %v2258_v46  ;;  %2390 = vmatmul.msk.bf16.gmra.mxu3 %vm3288_vm5, %v3292_v38  ;;  %v2298_v38 = vor.u32 %v2915_v41, %v2295_v42  ;;  %v2462_v59 = vor.u32 %v2946_v63, %v2461_v20  ;;  %v2430_v42 = vor.u32 %v2938_v40, %v2429_v37  ;;  %v2934_v20 = vld [vmem:[#allocation5 + $0x314] sm:$0xf0]  ;;  %v2717_v40 = vld [vmem:[#allocation5 + $0x570] sm:$0xf] }
  0x65   :  { %987 = vmatpush.bf16.msra.mxu3 %v2322_v36  ;;  %v2549_v36 = vld [vmem:[#allocation5 + $0x420] sm:$0xf] }
  0x66   :  { %931 = vmatpush.bf16.msra.mxu0 %v2122_v10 }
  0x67   :  { %950 = vmatpush.bf16.msra.mxu1 %v2186_v21 }
  0x68   :  { %969 = vmatpush.bf16.msra.mxu2 %v2250_v62  ;;  %v2968_v62 = vld [vmem:[#allocation5 + $0x424] sm:$0xf0] }
  0x69   :  { %988 = vmatpush.bf16.msra.mxu3 %v2314_v14  ;;  %v2550_v6 = vor.u32 %v2968_v62, %v2549_v36  ;;  %v2939_v62 = vld [vmem:[#allocation5 + $0x344] sm:$0xf] }
  0x6a   :  { %932 = vmatpush.bf16.msra.mxu0 %v2114_v26  ;;  %v2945_v26 = vld [vmem:[#allocation5 + $0x374] sm:$0xf] }
  0x6b   :  { %951 = vmatpush.bf16.msra.mxu1 %v2178_v27  ;;  %v2463_v27 = vld [vmem:[#allocation5 + $0x378] sm:$0xf0] }
  0x6c   :  { %970 = vmatpush.bf16.msra.mxu2 %v2242_v15  ;;  %v2446_v15 = vor.u32 %v2942_v13, %v2445_v12  ;;  %v2466_v61 = vor.u32 %v2945_v26, %v2463_v27  ;;  %v2405_v13 = vld [vmem:[#allocation5 + $0x300] sm:$0xf]  ;;  %v2988_v26 = vld [vmem:[#allocation5 + $0x4c4] sm:$0xf0] }
  0x6d   :  { %989 = vmatpush.bf16.msra.mxu3 %v2306_v31 }
  0x6e   :  { %933 = vmatpush.bf16.msra.mxu0 %v2106_v11  ;;  %v2943_v11 = vld [vmem:[#allocation5 + $0x364] sm:$0xf] }
  0x6f   :  { %952 = vmatpush.bf16.msra.mxu1 %v2170_v43  ;;  %v2455_v43 = vld [vmem:[#allocation5 + $0x368] sm:$0xf0] }
  0x70   :  { %971 = vmatpush.bf16.msra.mxu2 %v2234_v32 }
  0x71   :  { %990 = vmatpush.bf16.msra.mxu3 %v2298_v38  ;;  %934 = vmatmul.bf16.vlgmr.msra.gmra.mxu0 %v3242_v4  ;;  %v2589_v4 = vld [vmem:[#allocation5 + $0x470] sm:$0xf] }
  0x72   :  { %953 = vmatmul.bf16.vlgmr.msra.gmra.mxu1 %v3246_v7  ;;  %v2978_v7 = vld [vmem:[#allocation5 + $0x474] sm:$0xf0]  ;;  %1673 = vmatpush.bf16.msrb.mxu0 %v2462_v59 }
  0x73   :  { %2393 = vmatmul.msk.bf16.vlgmr.msra.gmra.mxu2 %vm3345_vm8, %v3338_v52  ;;  %v2590_v44 = vor.u32 %v2978_v7, %v2589_v4  ;;  %v2976_v52 = vld [vmem:[#allocation5 + $0x464] sm:$0xf0]  ;;  %v2458_v4 = vor.u32 %v2943_v11, %v2455_v43  ;;  %v2653_v7 = vld [vmem:[#allocation5 + $0x4f0] sm:$0xf]  ;;  %v3458_v11 = vperm.slane %v3447_v23, 0 }
  0x74   :  { %2399 = vmatmul.msk.bf16.vlgmr.msra.gmra.mxu3 %vm3345_vm8, %v3340_v53  ;;  %v2582_v46 = vor.u32 %v2976_v52, %v2581_v45  ;;  %v2974_v53 = vld [vmem:[#allocation5 + $0x454] sm:$0xf0] }
  0x75   :  { %1711 = vmatpush.bf16.msrb.mxu2 %v2590_v44  ;;  %v2574_v48 = vor.u32 %v2974_v53, %v2573_v47  ;;  %v2994_v44 = vld [vmem:[#allocation5 + $0x4f4] sm:$0xf0]  ;;  %v2936_v47 = vld [vmem:[#allocation5 + $0x324] sm:$0xf0] }
  0x76   :  { %v2654_v52 = vor.u32 %v2994_v44, %v2653_v7  ;;  %v2935_v7 = vld [vmem:[#allocation5 + $0x324] sm:$0xf]  ;;  %v2423_v44 = vld [vmem:[#allocation5 + $0x328] sm:$0xf0] }
  0x78   :  { %1730 = vmatpush.bf16.msrb.mxu3 %v2654_v52 }
  0x79   :  { %1712 = vmatpush.bf16.msrb.mxu2 %v2582_v46  ;;  %v2421_v46 = vld [vmem:[#allocation5 + $0x320] sm:$0xf] }
  0x7a   :  { %v2422_v53 = vor.u32 %v2936_v47, %v2421_v46  ;;  %v2426_v46 = vor.u32 %v2935_v7, %v2423_v44  ;;  %v2621_v47 = vld [vmem:[#allocation5 + $0x4b0] sm:$0xf]  ;;  %v3009_v44 = vld [vmem:[#allocation5 + $0x574] sm:$0xf] }
  0x7d   :  { %1713 = vmatpush.bf16.msrb.mxu2 %v2574_v48  ;;  %v2941_v48 = vld [vmem:[#allocation5 + $0x354] sm:$0xf] }
  0x7e   :  { %v2450_v50 = vor.u32 %v2941_v48, %v2447_v49 }
  0x81   :  { %939 = vmatmul.bf16.gmra.mxu0 %v3296_v16  ;;  %1714 = vmatpush.bf16.msrb.mxu2 %v2566_v51 }
  0x82   :  { %958 = vmatmul.bf16.gmra.mxu1 %v3300_v19 }
  0x83   :  { %2396 = vmatmul.msk.bf16.gmra.mxu2 %vm3387_vm10, %v2371_v5  ;;  %v2454_v5 = vor.u32 %v2944_v29, %v2453_v1 }
  0x84   :  { %2402 = vmatmul.msk.bf16.gmra.mxu3 %vm3387_vm10, %v2377_v34  ;;  %v2541_v34 = vld [vmem:[#allocation5 + $0x410] sm:$0xf] }
  0x85   :  { %1715 = vmatpush.bf16.msrb.mxu2 %v2558_v35  ;;  %v2542_v33 = vor.u32 %v2966_v0, %v2541_v34  ;;  %1674 = vmatpush.bf16.msrb.mxu0 %v2454_v5  ;;  %v2646_v35 = vor.u32 %v2992_v28, %v2645_v54  ;;  %v3444_v5 = vld [vmem:[#allocation7] ss:$8 sm:$0x3]  ;;  %v2990_v0 = vld [vmem:[#allocation5 + $0x4d4] sm:$0xf0] }
  0x86   :  { %v2709_v54 = vld [vmem:[#allocation5 + $0x560] sm:$0xf]  ;;  %v3008_v28 = vld [vmem:[#allocation5 + $0x564] sm:$0xf0] }
  0x87   :  { %1731 = vmatpush.bf16.msrb.mxu3 %v2646_v35  ;;  %v2933_v35 = vld [vmem:[#allocation5 + $0x314] sm:$0xf] }
  0x89   :  { %1716 = vmatpush.bf16.msrb.mxu2 %v2550_v6  ;;  %1675 = vmatpush.bf16.msrb.mxu0 %v2446_v15  ;;  %v2439_v6 = vld [vmem:[#allocation5 + $0x348] sm:$0xf0]  ;;  %v2932_v15 = vld [vmem:[#allocation5 + $0x304] sm:$0xf0] }
  0x8a   :  { %v2442_v34 = vor.u32 %v2939_v62, %v2439_v6  ;;  %v2406_v17 = vor.u32 %v2932_v15, %v2405_v13  ;;  %v2613_v62 = vld [vmem:[#allocation5 + $0x4a0] sm:$0xf] }
  0x8d   :  { %1717 = vmatpush.bf16.msrb.mxu2 %v2542_v33  ;;  %1676 = vmatpush.bf16.msrb.mxu0 %v2438_v25  ;;  %v2629_v25 = vld [vmem:[#allocation5 + $0x4c0] sm:$0xf] }
  0x8e   :  { %v2630_v37 = vor.u32 %v2988_v26, %v2629_v25  ;;  %v2517_v25 = vld [vmem:[#allocation5 + $0x3e0] sm:$0xf]  ;;  %v2960_v26 = vld [vmem:[#allocation5 + $0x3e4] sm:$0xf0] }
  0x91   :  { %1718 = vmatpush.bf16.msrb.mxu2 %v2534_v22  ;;  %1677 = vmatpush.bf16.msrb.mxu0 %v2430_v42  ;;  %v2431_v22 = vld [vmem:[#allocation5 + $0x338] sm:$0xf0]  ;;  %v3010_v42 = vld [vmem:[#allocation5 + $0x574] sm:$0xf0] }
  0x92   :  { %v2434_v30 = vor.u32 %v2937_v18, %v2431_v22  ;;  %v2931_v18 = vld [vmem:[#allocation5 + $0x304] sm:$0xf]  ;;  %v2407_v22 = vld [vmem:[#allocation5 + $0x308] sm:$0xf0] }
  0x95   :  { %1787 = vmatpush.bf16.msra.mxu2 %v2466_v61  ;;  %1678 = vmatpush.bf16.msrb.mxu0 %v2422_v53  ;;  %v2986_v53 = vld [vmem:[#allocation5 + $0x4b4] sm:$0xf0] }
  0x99   :  { %1788 = vmatpush.bf16.msra.mxu2 %v2458_v4  ;;  %v2718_v4 = vor.u32 %v3010_v42, %v2717_v40  ;;  %v2605_v40 = vld [vmem:[#allocation5 + $0x490] sm:$0xf]  ;;  %v2982_v42 = vld [vmem:[#allocation5 + $0x494] sm:$0xf0] }
  0x9d   :  { %1789 = vmatpush.bf16.msra.mxu2 %v2450_v50  ;;  %v2622_v50 = vor.u32 %v2986_v53, %v2621_v47  ;;  %v2597_v53 = vld [vmem:[#allocation5 + $0x480] sm:$0xf] }
  0xa1   :  { %1790 = vmatpush.bf16.msra.mxu2 %v2442_v34 }
  0xa5   :  { %1791 = vmatpush.bf16.msra.mxu2 %v2434_v30 }
  0xa9   :  { %1792 = vmatpush.bf16.msra.mxu2 %v2426_v46  ;;  %v2958_v46 = vld [vmem:[#allocation5 + $0x3d4] sm:$0xf0] }
  0xae   :  { %v783_v16 = vpop.f32.mrf.mxu0 }
  0xaf   :  { %v802_v19 = vpop.f32.mrf.mxu1 }
  0xb0   :  { %v803_v38 = vadd.f32 %v802_v19, %v783_v16 }
  0xb6   :  { %v821_v55 = vpop.f32.mrf.mxu2  ;;  %v3417_v24 = vpop.f32.mrf.mxu0 }
  0xb7   :  { %v3415_v56 = vpop.f32.mrf.mxu3  ;;  %v3419_v58 = vpop.f32.mrf.mxu1  ;;  %v822_v45 = vadd.f32 %v821_v55, %v803_v38  ;;  %v2413_v55 = vld [vmem:[#allocation5 + $0x310] sm:$0xf] }
  0xb8   :  { %v2414_v36 = vor.u32 %v2934_v20, %v2413_v55  ;;  %v805_v1 = vadd.f32 %v3419_v58, %v3417_v24  ;;  %v3450_v58 = vperm.slane %v3444_v5, 0  ;;  %v2415_v55 = vld [vmem:[#allocation5 + $0x318] sm:$0xf0]  ;;  %v2525_v20 = vld [vmem:[#allocation5 + $0x3f0] sm:$0xf] }
  0xb9   :  { %v841_v16 = vadd.f32 %v3415_v56, %v822_v45  ;;  %v2637_v56 = vld [vmem:[#allocation5 + $0x4d0] sm:$0xf] }
  0xba   :  { %1679 = vmatpush.bf16.msrb.mxu0 %v2414_v36  ;;  %v2638_v12 = vor.u32 %v2990_v0, %v2637_v56  ;;  %v2701_v0 = vld [vmem:[#allocation5 + $0x550] sm:$0xf] }
  0xbc   :  { %1732 = vmatpush.bf16.msrb.mxu3 %v2638_v12 }
  0xbe   :  { %v3421_v8 = vpop.f32.mrf.mxu2  ;;  %v3425_v21 = vpop.f32.mrf.mxu0  ;;  %1680 = vmatpush.bf16.msrb.mxu0 %v2406_v17 }
  0xbf   :  { %v3423_v10 = vpop.f32.mrf.mxu3  ;;  %v3427_v14 = vpop.f32.mrf.mxu1  ;;  %v824_v33 = vadd.f32 %v3421_v8, %v805_v1 }
  0xc0   :  { %v808_v45 = vadd.f32 %v3427_v14, %v3425_v21  ;;  %1733 = vmatpush.bf16.msrb.mxu3 %v2630_v37  ;;  %v2518_v37 = vor.u32 %v2960_v26, %v2517_v25  ;;  %v2493_v25 = vld [vmem:[#allocation5 + $0x3b0] sm:$0xf]  ;;  %v2954_v26 = vld [vmem:[#allocation5 + $0x3b4] sm:$0xf0] }
  0xc1   :  { %v843_v8 = vadd.f32 %v3423_v10, %v824_v33  ;;  %v3006_v33 = vld [vmem:[#allocation5 + $0x554] sm:$0xf0] }
  0xc2   :  { %1749 = vmatpush.bf16.msra.mxu0 %v2718_v4  ;;  %v2702_v17 = vor.u32 %v3006_v33, %v2701_v0  ;;  %v2606_v4 = vor.u32 %v2982_v42, %v2605_v40  ;;  %v2959_v40 = vld [vmem:[#allocation5 + $0x3e4] sm:$0xf]  ;;  %v2519_v42 = vld [vmem:[#allocation5 + $0x3e8] sm:$0xf0] }
  0xc4   :  { %1734 = vmatpush.bf16.msrb.mxu3 %v2622_v50 }
  0xc6   :  { %v3429_v31 = vpop.f32.mrf.mxu2  ;;  %v3433_v3 = vpop.f32.mrf.mxu0 }
  0xc7   :  { %v3431_v32 = vpop.f32.mrf.mxu3  ;;  %v3435_v41 = vpop.f32.mrf.mxu1  ;;  %v827_v48 = vadd.f32 %v3429_v31, %v808_v45  ;;  %v2984_v31 = vld [vmem:[#allocation5 + $0x4a4] sm:$0xf0]  ;;  %v2719_v45 = vld [vmem:[#allocation5 + $0x578] sm:$0xf0] }
  0xc8   :  { %v2614_v56 = vor.u32 %v2984_v31, %v2613_v62  ;;  %v810_v12 = vadd.f32 %v3435_v41, %v3433_v3  ;;  %v2722_v47 = vor.u32 %v3009_v44, %v2719_v45  ;;  %v2501_v62 = vld [vmem:[#allocation5 + $0x3c0] sm:$0xf]  ;;  %v2956_v31 = vld [vmem:[#allocation5 + $0x3c4] sm:$0xf0]  ;;  %v2998_v44 = vld [vmem:[#allocation5 + $0x514] sm:$0xf0] }
  0xc9   :  { %v846_v6 = vadd.f32 %v3431_v32, %v827_v48  ;;  %v2980_v48 = vld [vmem:[#allocation5 + $0x484] sm:$0xf0] }
  0xca   :  { %1735 = vmatpush.bf16.msrb.mxu3 %v2614_v56  ;;  %v2527_v56 = vld [vmem:[#allocation5 + $0x3f8] sm:$0xf0] }
  0xce   :  { %v3437_v51 = vpop.f32.mrf.mxu2  ;;  %v859_v63 = vpop.f32.mrf.mxu0  ;;  %1736 = vmatpush.bf16.msrb.mxu3 %v2606_v4  ;;  %v2522_v4 = vor.u32 %v2959_v40, %v2519_v42 }
  0xcf   :  { %v3440_v19 = vpop.f32.mrf.mxu3  ;;  %v878_v59 = vpop.f32.mrf.mxu1  ;;  %v860_v29 = vadd.f32 %v859_v63, %v841_v16  ;;  %v2710_v16 = vor.u32 %v3008_v28, %v2709_v54  ;;  %v2962_v63 = vld [vmem:[#allocation5 + $0x3f4] sm:$0xf0]  ;;  %v829_v3 = vadd.f32 %v3437_v51, %v810_v12  ;;  %v2598_v28 = vor.u32 %v2980_v48, %v2597_v53  ;;  %v2677_v12 = vld [vmem:[#allocation5 + $0x520] sm:$0xf] }
  0xd0   :  { %v2526_v36 = vor.u32 %v2962_v63, %v2525_v20  ;;  %v3007_v20 = vld [vmem:[#allocation5 + $0x564] sm:$0xf]  ;;  %v2711_v63 = vld [vmem:[#allocation5 + $0x568] sm:$0xf0]  ;;  %v2485_v48 = vld [vmem:[#allocation5 + $0x3a0] sm:$0xf] }
  0xd1   :  { %v879_v24 = vadd.f32 %v878_v59, %v860_v29  ;;  %v2418_v59 = vor.u32 %v2933_v35, %v2415_v55  ;;  %1750 = vmatpush.bf16.msra.mxu0 %v2710_v16  ;;  %v2685_v16 = vld [vmem:[#allocation5 + $0x530] sm:$0xf]  ;;  %v3002_v35 = vld [vmem:[#allocation5 + $0x534] sm:$0xf0] }
  0xd2   :  { %1692 = vmatpush.bf16.msrb.mxu1 %v2526_v36  ;;  %1737 = vmatpush.bf16.msrb.mxu3 %v2598_v28 }
  0xd3   :  { %v1007_v10 = vmul.f32 %v3450_v58, %v879_v24  ;;  %1793 = vmatpush.bf16.msra.mxu2 %v2418_v59 }
  0xd5   :  { %v1020_v21 = vadd.f32 %v3458_v11, %v1007_v10  ;;  %1751 = vmatpush.bf16.msra.mxu0 %v2702_v17  ;;  %v3005_v17 = vld [vmem:[#allocation5 + $0x554] sm:$0xf] }
  0xd6   :  { %v3453_v27 = vpop.f32.mrf.mxu2  ;;  %v861_v43 = vpop.f32.mrf.mxu0  ;;  %1693 = vmatpush.bf16.msrb.mxu1 %v2518_v37  ;;  %v2494_v37 = vor.u32 %v2954_v26, %v2493_v25  ;;  %v2977_v25 = vld [vmem:[#allocation5 + $0x474] sm:$0xf]  ;;  %v2591_v26 = vld [vmem:[#allocation5 + $0x478] sm:$0xf0] }
  0xd7   :  { %v3455_v61 = vpop.f32.mrf.mxu3  ;;  %v880_v38 = vpop.f32.mrf.mxu1  ;;  %v862_v52 = vadd.f32 %v861_v43, %v843_v8  ;;  %v3474_v32 = vmax.f32 %v1020_v21, 0.0  ;;  %v2410_v8 = vor.u32 %v2931_v18, %v2407_v22  ;;  %v2693_v43 = vld [vmem:[#allocation5 + $0x540] sm:$0xf]  ;;  %v2703_v18 = vld [vmem:[#allocation5 + $0x558] sm:$0xf0]  ;;  %v2594_v42 = vor.u32 %v2977_v25, %v2591_v26 }
  0xd8   :  { %v2479_v26 = vld [vmem:[#allocation5 + $0x398] sm:$0xf0] }
  0xd9   :  { %v881_v49 = vadd.f32 %v880_v38, %v862_v52  ;;  %1794 = vmatpush.bf16.msra.mxu2 %v2410_v8  ;;  %v3004_v38 = vld [vmem:[#allocation5 + $0x544] sm:$0xf0]  ;;  %v2509_v52 = vld [vmem:[#allocation5 + $0x3d0] sm:$0xf]  ;;  %v2706_v8 = vor.u32 %v3005_v17, %v2703_v18  ;;  %v2503_v17 = vld [vmem:[#allocation5 + $0x3c8] sm:$0xf0] }
  0xda   :  { %v2694_v7 = vor.u32 %v3004_v38, %v2693_v43  ;;  %v2510_v51 = vor.u32 %v2958_v46, %v2509_v52 }
  0xdb   :  { %v1009_v14 = vmul.f32 %v3450_v58, %v881_v49  ;;  %v848_v49 = vadd.f32 %v3440_v19, %v829_v3  ;;  %v2714_v19 = vor.u32 %v3007_v20, %v2711_v63  ;;  %v2661_v63 = vld [vmem:[#allocation5 + $0x500] sm:$0xf] }
  0xdc   :  { %1752 = vmatpush.bf16.msra.mxu0 %v2694_v7  ;;  %1694 = vmatpush.bf16.msrb.mxu1 %v2510_v51  ;;  %v2669_v7 = vld [vmem:[#allocation5 + $0x510] sm:$0xf]  ;;  %v2695_v51 = vld [vmem:[#allocation5 + $0x548] sm:$0xf0] }
  0xdd   :  { %v1022_v1 = vadd.f32 %v3458_v11, %v1009_v14  ;;  %v2686_v14 = vor.u32 %v3002_v35, %v2685_v16  ;;  %v2670_v46 = vor.u32 %v2998_v44, %v2669_v7  ;;  %v2469_v44 = vld [vmem:[#allocation5 + $0x380] sm:$0xf] }
  0xde   :  { %v3468_v29 = vpop.f32.mrf.mxu2  ;;  %v864_v13 = vpop.f32.mrf.mxu0 }
  0xdf   :  { %v3470_v34 = vpop.f32.mrf.mxu3  ;;  %v883_v15 = vpop.f32.mrf.mxu1  ;;  %v3476_v24 = vmax.f32 %v1022_v1, 0.0  ;;  %v865_v30 = vadd.f32 %v864_v13, %v846_v6  ;;  %v2502_v6 = vor.u32 %v2956_v31, %v2501_v62  ;;  %v2961_v1 = vld [vmem:[#allocation5 + $0x3f4] sm:$0xf]  ;;  %v3000_v13 = vld [vmem:[#allocation5 + $0x524] sm:$0xf0] }
  0xe0   :  { %1753 = vmatpush.bf16.msra.mxu0 %v2686_v14  ;;  %v2530_v33 = vor.u32 %v2961_v1, %v2527_v56  ;;  %v3001_v62 = vld [vmem:[#allocation5 + $0x534] sm:$0xf]  ;;  %v2687_v31 = vld [vmem:[#allocation5 + $0x538] sm:$0xf0]  ;;  %v2477_v1 = vld [vmem:[#allocation5 + $0x390] sm:$0xf] }
  0xe1   :  { %v3481_v41 = vpack.c.bf16 %v3476_v24, %v3474_v32  ;;  %v884_v10 = vadd.f32 %v883_v15, %v865_v30  ;;  %1695 = vmatpush.bf16.msrb.mxu1 %v2502_v6  ;;  %v2678_v15 = vor.u32 %v3000_v13, %v2677_v12  ;;  %v1135_v45 = vrot.slane %v3476_v24, 7  ;;  %v2950_v56 = vld [vmem:[#allocation5 + $0x394] sm:$0xf0] }
  0xe2   :  { %1806 = vmatpush.bf16.msra.mxu3 %v2530_v33  ;;  %v2478_v13 = vor.u32 %v2950_v56, %v2477_v1  ;;  %v2973_v56 = vld [vmem:[#allocation5 + $0x454] sm:$0xf] }
  0xe3   :  { %1719 = vmatmul.bf16.vlgmr.msrb.gmra.mxu2 %v3481_v41  ;;  %v1011_v59 = vmul.f32 %v3450_v58, %v884_v10 }
  0xe4   :  { %1863 = vmatpush.bf16.msrb.mxu2 %v2722_v47  ;;  %1754 = vmatpush.bf16.msra.mxu0 %v2678_v15  ;;  %v3003_v47 = vld [vmem:[#allocation5 + $0x544] sm:$0xf] }
  0xe5   :  { %v1024_v22 = vadd.f32 %v3458_v11, %v1011_v59  ;;  %1696 = vmatpush.bf16.msrb.mxu1 %v2494_v37  ;;  %v2698_v28 = vor.u32 %v3003_v47, %v2695_v51  ;;  %v2996_v59 = vld [vmem:[#allocation5 + $0x504] sm:$0xf0]  ;;  %v2955_v15 = vld [vmem:[#allocation5 + $0x3c4] sm:$0xf]  ;;  %v2953_v47 = vld [vmem:[#allocation5 + $0x3b4] sm:$0xf] }
  0xe6   :  { %v3485_v50 = vpop.f32.mrf.mxu2  ;;  %v866_v55 = vpop.f32.mrf.mxu0  ;;  %1807 = vmatpush.bf16.msra.mxu3 %v2522_v4  ;;  %v2679_v4 = vld [vmem:[#allocation5 + $0x528] sm:$0xf0]  ;;  %v2975_v51 = vld [vmem:[#allocation5 + $0x464] sm:$0xf] }
  0xe7   :  { %v3487_v54 = vpop.f32.mrf.mxu3  ;;  %v885_v21 = vpop.f32.mrf.mxu1  ;;  %v867_v36 = vadd.f32 %v866_v55, %v848_v49  ;;  %v2952_v49 = vld [vmem:[#allocation5 + $0x3a4] sm:$0xf0]  ;;  %v1133_v55 = vrot.slane %v3474_v32, 7 }
  0xe8   :  { %1864 = vmatpush.bf16.msrb.mxu2 %v2714_v19  ;;  %1755 = vmatpush.bf16.msra.mxu0 %v2670_v46  ;;  %v2486_v35 = vor.u32 %v2952_v49, %v2485_v48  ;;  %v2583_v48 = vld [vmem:[#allocation5 + $0x468] sm:$0xf0] }
  0xe9   :  { %v886_v0 = vadd.f32 %v885_v21, %v867_v36  ;;  %v2662_v36 = vor.u32 %v2996_v59, %v2661_v63  ;;  %v1145_v19 = vsel %vm240_vm0, %v1133_v55, %v1135_v45  ;;  %v3530_v63 = vperm.slane %v3447_v23, 1 }
  0xea   :  { %1697 = vmatpush.bf16.msrb.mxu1 %v2486_v35  ;;  %v2997_v35 = vld [vmem:[#allocation5 + $0x514] sm:$0xf] }
  0xeb   :  { %v1013_v30 = vmul.f32 %v3450_v58, %v886_v0  ;;  %v917_v58 = vadd.f32 %v3455_v61, %v3453_v27  ;;  %v2957_v27 = vld [vmem:[#allocation5 + $0x3d4] sm:$0xf]  ;;  %v2511_v61 = vld [vmem:[#allocation5 + $0x3d8] sm:$0xf0]  ;;  %v2690_v0 = vor.u32 %v3001_v62, %v2687_v31  ;;  %v2951_v62 = vld [vmem:[#allocation5 + $0x3a4] sm:$0xf] }
  0xec   :  { %1865 = vmatpush.bf16.msrb.mxu2 %v2706_v8  ;;  %v2514_v20 = vor.u32 %v2957_v27, %v2511_v61  ;;  %1756 = vmatpush.bf16.msra.mxu0 %v2662_v36  ;;  %v919_v8 = vadd.f32 %v3470_v34, %v3468_v29  ;;  %v2495_v29 = vld [vmem:[#allocation5 + $0x3b8] sm:$0xf0]  ;;  %v2781_v61 = vld [vmem:[#allocation5 + $0x5f0] sm:$0xf]  ;;  %v2487_v31 = vld [vmem:[#allocation5 + $0x3a8] sm:$0xf0] }
  0xed   :  { %v1026_v3 = vadd.f32 %v3458_v11, %v1013_v30  ;;  %v3500_v11 = vmax.f32 %v1024_v22, 0.0  ;;  %v2506_v30 = vor.u32 %v2955_v15, %v2503_v17  ;;  %v2498_v34 = vor.u32 %v2953_v47, %v2495_v29  ;;  %v2671_v27 = vld [vmem:[#allocation5 + $0x518] sm:$0xf0]  ;;  %v2765_v47 = vld [vmem:[#allocation5 + $0x5d0] sm:$0xf] }
  0xee   :  { %v3493_v43 = vpop.f32.mrf.mxu2  ;;  %v935_v10 = vpop.f32.mrf.mxu0  ;;  %1808 = vmatpush.bf16.msra.mxu3 %v2514_v20  ;;  %1698 = vmatpush.bf16.msrb.mxu1 %v2478_v13  ;;  %v2674_v20 = vor.u32 %v2997_v35, %v2671_v27  ;;  %v2490_v1 = vor.u32 %v2951_v62, %v2487_v31  ;;  %v2947_v35 = vld [vmem:[#allocation5 + $0x384] sm:$0xf]  ;;  %v2471_v27 = vld [vmem:[#allocation5 + $0x388] sm:$0xf0]  ;;  %v2559_v62 = vld [vmem:[#allocation5 + $0x438] sm:$0xf0] }
  0xef   :  { %v3495_v38 = vpop.f32.mrf.mxu3  ;;  %v954_v52 = vpop.f32.mrf.mxu1  ;;  %v3502_v53 = vmax.f32 %v1026_v3, 0.0  ;;  %v936_v16 = vadd.f32 %v935_v10, %v917_v58  ;;  %v2999_v3 = vld [vmem:[#allocation5 + $0x524] sm:$0xf]  ;;  %v2948_v58 = vld [vmem:[#allocation5 + $0x384] sm:$0xf0]  ;;  %v1137_v17 = vrot.slane %v3500_v11, 7 }
  0xf0   :  { %1866 = vmatpush.bf16.msrb.mxu2 %v2698_v28  ;;  %v2682_v10 = vor.u32 %v2999_v3, %v2679_v4  ;;  %v2470_v46 = vor.u32 %v2948_v58, %v2469_v44  ;;  %v3527_v28 = vperm.slane %v3444_v5, 1  ;;  %v922_v5 = vadd.f32 %v3487_v54, %v3485_v50  ;;  %v2663_v50 = vld [vmem:[#allocation5 + $0x508] sm:$0xf0]  ;;  %v2949_v54 = vld [vmem:[#allocation5 + $0x394] sm:$0xf] }
  0xf1   :  { %v1139_v21 = vrot.slane %v3502_v53, 7  ;;  %v3508_v14 = vpack.c.bf16 %v3502_v53, %v3500_v11  ;;  %v955_v33 = vadd.f32 %v954_v52, %v936_v16  ;;  %v2586_v16 = vor.u32 %v2975_v51, %v2583_v48  ;;  %v2567_v3 = vld [vmem:[#allocation5 + $0x448] sm:$0xf0] }
  0xf2   :  { %1809 = vmatpush.bf16.msra.mxu3 %v2506_v30  ;;  %1699 = vmatpush.bf16.msrb.mxu1 %v2470_v46  ;;  %v2995_v30 = vld [vmem:[#allocation5 + $0x504] sm:$0xf]  ;;  %v2482_v44 = vor.u32 %v2949_v54, %v2479_v26  ;;  %v1143_v46 = vsel %vm240_vm0, %v1135_v45, %v1137_v17 }
  0xf3   :  { %1724 = vmatmul.bf16.gmra.mxu2 %v3508_v14  ;;  %v1147_v6 = vsel %vm240_vm0, %v1139_v21, %v1133_v55  ;;  %v3026_v55 = vld [vmem:[#allocation5 + $0x5f4] sm:$0xf0]  ;;  %v3023_v26 = vld [vmem:[#allocation5 + $0x5e4] sm:$0xf] }
  0xf4   :  { %v3519_v12 = vpack.c.bf16 %v1145_v19, %v1147_v6  ;;  %1867 = vmatpush.bf16.msrb.mxu2 %v2690_v0  ;;  %v2782_v36 = vor.u32 %v3026_v55, %v2781_v61  ;;  %v2575_v0 = vld [vmem:[#allocation5 + $0x458] sm:$0xf0] }
  0xf6   :  { %v973_v18 = vpop.f32.mrf.mxu2  ;;  %v937_v40 = vpop.f32.mrf.mxu0  ;;  %2789 = vmatmul.msk.bf16.vlgmr.msrb.gmra.mxu0 %vm3234_vm3, %v3519_v12  ;;  %1810 = vmatpush.bf16.msra.mxu3 %v2498_v34 }
  0xf7   :  { %v992_v22 = vpop.f32.mrf.mxu3  ;;  %v974_v37 = vadd.f32 %v973_v18, %v955_v33  ;;  %v956_v7 = vpop.f32.mrf.mxu1  ;;  %v938_v52 = vadd.f32 %v937_v40, %v919_v8  ;;  %1825 = vmatpush.bf16.msrb.mxu0 %v2594_v42  ;;  %v2773_v33 = vld [vmem:[#allocation5 + $0x5e0] sm:$0xf]  ;;  %1768 = vmatpush.bf16.msra.mxu1 %v2782_v36  ;;  %v2578_v18 = vor.u32 %v2973_v56, %v2575_v0  ;;  %v2971_v42 = vld [vmem:[#allocation5 + $0x444] sm:$0xf]  ;;  %v2969_v36 = vld [vmem:[#allocation5 + $0x434] sm:$0xf] }
  0xf8   :  { %1868 = vmatpush.bf16.msrb.mxu2 %v2682_v10  ;;  %v2666_v40 = vor.u32 %v2995_v30, %v2663_v50  ;;  %v2570_v58 = vor.u32 %v2971_v42, %v2567_v3  ;;  %v2562_v31 = vor.u32 %v2969_v36, %v2559_v62  ;;  %v2783_v56 = vld [vmem:[#allocation5 + $0x5f8] sm:$0xf0]  ;;  %v2749_v30 = vld [vmem:[#allocation5 + $0x5b0] sm:$0xf] }
  0xf9   :  { %v993_v49 = vadd.f32 %v992_v22, %v974_v37  ;;  %v957_v59 = vadd.f32 %v956_v7, %v938_v52  ;;  %v3024_v22 = vld [vmem:[#allocation5 + $0x5e4] sm:$0xf0]  ;;  %v1141_v7 = vsel %vm240_vm0, %v1137_v17, %v1139_v21  ;;  %v3022_v21 = vld [vmem:[#allocation5 + $0x5d4] sm:$0xf0] }
  0xfa   :  { %1811 = vmatpush.bf16.msra.mxu3 %v2490_v1  ;;  %v2774_v25 = vor.u32 %v3024_v22, %v2773_v33  ;;  %v3550_v51 = vpack.c.bf16 %v1141_v7, %v1143_v46  ;;  %v2766_v48 = vor.u32 %v3022_v21, %v2765_v47  ;;  %v3025_v1 = vld [vmem:[#allocation5 + $0x5f4] sm:$0xf]  ;;  %v2543_v7 = vld [vmem:[#allocation5 + $0x418] sm:$0xf0] }
  0xfb   :  { %1826 = vmatpush.bf16.msrb.mxu0 %v2586_v16  ;;  %v1008_v13 = vmul.f32 %v3527_v28, %v993_v49  ;;  %v924_v49 = vadd.f32 %v3495_v38, %v3493_v43  ;;  %v2757_v43 = vld [vmem:[#allocation5 + $0x5c0] sm:$0xf]  ;;  %v3020_v38 = vld [vmem:[#allocation5 + $0x5c4] sm:$0xf0]  ;;  %v2786_v33 = vor.u32 %v3025_v1, %v2783_v56  ;;  %v3021_v46 = vld [vmem:[#allocation5 + $0x5d4] sm:$0xf] }
  0xfc   :  { %1869 = vmatpush.bf16.msrb.mxu2 %v2674_v20  ;;  %1769 = vmatpush.bf16.msra.mxu1 %v2774_v25  ;;  %v3018_v25 = vld [vmem:[#allocation5 + $0x5b4] sm:$0xf0]  ;;  %v2767_v47 = vld [vmem:[#allocation5 + $0x5d8] sm:$0xf0]  ;;  %v3012_v1 = vld [vmem:[#allocation5 + $0x584] sm:$0xf0] }
  0xfd   :  { %v1021_v10 = vadd.f32 %v3530_v63, %v1008_v13  ;;  %v2967_v13 = vld [vmem:[#allocation5 + $0x424] sm:$0xf]  ;;  %v2750_v54 = vor.u32 %v3018_v25, %v2749_v30  ;;  %v1163_v25 = vrot.slane %v3502_v53, 1  ;;  %v2639_v53 = vld [vmem:[#allocation5 + $0x4d8] sm:$0xf0] }
  0xfe   :  { %v975_v19 = vpop.f32.mrf.mxu2  ;;  %v940_v23 = vpop.f32.mrf.mxu0  ;;  %1812 = vmatpush.bf16.msra.mxu3 %v2482_v44  ;;  %v2741_v44 = vld [vmem:[#allocation5 + $0x5a0] sm:$0xf] }
  0xff   :  { %v994_v6 = vpop.f32.mrf.mxu3  ;;  %v976_v15 = vadd.f32 %v975_v19, %v957_v59  ;;  %v941_v37 = vadd.f32 %v940_v23, %v922_v5  ;;  %1827 = vmatpush.bf16.msrb.mxu0 %v2578_v18  ;;  %v959_v4 = vpop.f32.mrf.mxu1  ;;  %v3554_v61 = vmax.f32 %v1021_v10, 0.0  ;;  %v2474_v59 = vor.u32 %v2947_v35, %v2471_v27 }
 0x100   :  { %1870 = vmatpush.bf16.msrb.mxu2 %v2666_v40  ;;  %1770 = vmatpush.bf16.msra.mxu1 %v2766_v48  ;;  %v1161_v18 = vrot.slane %v3500_v11, 1  ;;  %v1159_v40 = vrot.slane %v3476_v24, 1  ;;  %v2535_v48 = vld [vmem:[#allocation5 + $0x408] sm:$0xf0] }
 0x101   :  { %v995_v8 = vadd.f32 %v994_v6, %v976_v15  ;;  %v960_v34 = vadd.f32 %v959_v4, %v941_v37  ;;  %v2758_v6 = vor.u32 %v3020_v38, %v2757_v43  ;;  %v2551_v15 = vld [vmem:[#allocation5 + $0x428] sm:$0xf0]  ;;  %v2965_v37 = vld [vmem:[#allocation5 + $0x414] sm:$0xf]  ;;  %v3019_v43 = vld [vmem:[#allocation5 + $0x5c4] sm:$0xf] }
 0x102   :  { %1813 = vmatpush.bf16.msra.mxu3 %v2474_v59  ;;  %v2554_v17 = vor.u32 %v2967_v13, %v2551_v15  ;;  %v2546_v10 = vor.u32 %v2965_v37, %v2543_v7  ;;  %v1167_v24 = vsel %vm265_vm6, %v1159_v40, %v1161_v18  ;;  %v1134_v56 = vrot.slane %v3554_v61, 7  ;;  %v3017_v13 = vld [vmem:[#allocation5 + $0x5b4] sm:$0xf]  ;;  %v2751_v15 = vld [vmem:[#allocation5 + $0x5b8] sm:$0xf0] }
 0x103   :  { %v1010_v52 = vmul.f32 %v3527_v28, %v995_v8  ;;  %2813 = vmatmul.msk.bf16.vlgmr.msra.gmra.mxu2 %vm3234_vm3, %v3519_v12  ;;  %1828 = vmatpush.bf16.msrb.mxu0 %v2570_v58  ;;  %v2775_v8 = vld [vmem:[#allocation5 + $0x5e8] sm:$0xf0]  ;;  %v2735_v7 = vld [vmem:[#allocation5 + $0x598] sm:$0xf0] }
 0x104   :  { %1771 = vmatpush.bf16.msra.mxu1 %v2758_v6  ;;  %v2778_v4 = vor.u32 %v3023_v26, %v2775_v8  ;;  %v2725_v6 = vld [vmem:[#allocation5 + $0x580] sm:$0xf]  ;;  %v3015_v8 = vld [vmem:[#allocation5 + $0x5a4] sm:$0xf]  ;;  %v2743_v37 = vld [vmem:[#allocation5 + $0x5a8] sm:$0xf0] }
 0x105   :  { %v1023_v29 = vadd.f32 %v3530_v63, %v1010_v52  ;;  %v3016_v52 = vld [vmem:[#allocation5 + $0x5a4] sm:$0xf0] }
 0x106   :  { %v978_v16 = vpop.f32.mrf.mxu2  ;;  %v942_v20 = vpop.f32.mrf.mxu0  ;;  %2792 = vmatmul.msk.bf16.gmra.mxu0 %vm3288_vm5, %v3550_v51 }
 0x107   :  { %v997_v12 = vpop.f32.mrf.mxu3  ;;  %v3556_v45 = vmax.f32 %v1023_v29, 0.0  ;;  %v979_v55 = vadd.f32 %v978_v16, %v960_v34  ;;  %v943_v5 = vadd.f32 %v942_v20, %v924_v49  ;;  %1829 = vmatpush.bf16.msrb.mxu0 %v2562_v31  ;;  %v961_v23 = vpop.f32.mrf.mxu1  ;;  %v2742_v29 = vor.u32 %v3016_v52, %v2741_v44  ;;  %v2963_v34 = vld [vmem:[#allocation5 + $0x404] sm:$0xf]  ;;  %v3014_v20 = vld [vmem:[#allocation5 + $0x594] sm:$0xf0] }
 0x108   :  { %1772 = vmatpush.bf16.msra.mxu1 %v2750_v54  ;;  %v1157_v49 = vrot.slane %v3474_v32, 1  ;;  %v2770_v16 = vor.u32 %v3021_v46, %v2767_v47  ;;  %v2733_v32 = vld [vmem:[#allocation5 + $0x590] sm:$0xf]  ;;  %v2655_v54 = vld [vmem:[#allocation5 + $0x4f8] sm:$0xf0]  ;;  %v1165_v52 = vsel %vm265_vm6, %v1161_v18, %v1163_v25 }
 0x109   :  { %v3563_v19 = vpack.c.bf16 %v3556_v45, %v3554_v61  ;;  %v998_v0 = vadd.f32 %v997_v12, %v979_v55  ;;  %v962_v22 = vadd.f32 %v961_v23, %v943_v5  ;;  %v2538_v12 = vor.u32 %v2963_v34, %v2535_v48  ;;  %v2727_v34 = vld [vmem:[#allocation5 + $0x588] sm:$0xf0] }
 0x10a   :  { %v1169_v55 = vsel %vm265_vm6, %v1157_v49, %v1159_v40  ;;  %v2734_v62 = vor.u32 %v3014_v20, %v2733_v32  ;;  %v1136_v31 = vrot.slane %v3556_v45, 7  ;;  %v2991_v40 = vld [vmem:[#allocation5 + $0x4e4] sm:$0xf]  ;;  %v1171_v46 = vsel %vm265_vm6, %v1163_v25, %v1157_v49  ;;  %v2631_v18 = vld [vmem:[#allocation5 + $0x4c8] sm:$0xf0] }
 0x10b   :  { %1738 = vmatmul.bf16.vlgmr.msrb.gmra.mxu3 %v3563_v19  ;;  %1830 = vmatpush.bf16.msrb.mxu0 %v2554_v17  ;;  %v1012_v42 = vmul.f32 %v3527_v28, %v998_v0  ;;  %v2800_v36 = vpack.c.bf16 %v1167_v24, %v1169_v55  ;;  %v2987_v24 = vld [vmem:[#allocation5 + $0x4c4] sm:$0xf]  ;;  %v2623_v55 = vld [vmem:[#allocation5 + $0x4b8] sm:$0xf0] }
 0x10c   :  { %1882 = vmatpush.bf16.msrb.mxu3 %v2786_v33  ;;  %1773 = vmatpush.bf16.msra.mxu1 %v2742_v29  ;;  %v1146_v23 = vsel %vm240_vm0, %v1134_v56, %v1136_v31  ;;  %v3011_v29 = vld [vmem:[#allocation5 + $0x584] sm:$0xf] }
 0x10d   :  { %v1025_v35 = vadd.f32 %v3530_v63, %v1012_v42  ;;  %v2746_v42 = vor.u32 %v3015_v8, %v2743_v37  ;;  %v2730_v48 = vor.u32 %v3011_v29, %v2727_v34  ;;  %v2983_v20 = vld [vmem:[#allocation5 + $0x4a4] sm:$0xf] }
 0x10e   :  { %v980_v50 = vpop.f32.mrf.mxu2 }
 0x10f   :  { %v981_v3 = vadd.f32 %v980_v50, %v962_v22  ;;  %v999_v58 = vpop.f32.mrf.mxu3  ;;  %1831 = vmatpush.bf16.msrb.mxu0 %v2546_v10  ;;  %v3583_v38 = vmax.f32 %v1025_v35, 0.0  ;;  %v2754_v22 = vor.u32 %v3017_v13, %v2751_v15  ;;  %v2993_v50 = vld [vmem:[#allocation5 + $0x4f4] sm:$0xf] }
 0x110   :  { %1883 = vmatpush.bf16.msrb.mxu3 %v2778_v4  ;;  %1774 = vmatpush.bf16.msra.mxu1 %v2734_v62  ;;  %v2658_v26 = vor.u32 %v2993_v50, %v2655_v54  ;;  %v3013_v4 = vld [vmem:[#allocation5 + $0x594] sm:$0xf] }
 0x111   :  { %v1000_v21 = vadd.f32 %v999_v58, %v981_v3  ;;  %v2647_v3 = vld [vmem:[#allocation5 + $0x4e8] sm:$0xf0]  ;;  %v2738_v58 = vor.u32 %v3013_v4, %v2735_v7  ;;  %v2989_v10 = vld [vmem:[#allocation5 + $0x4d4] sm:$0xf]  ;;  %v1138_v11 = vrot.slane %v3583_v38, 7 }
 0x112   :  { %v2650_v44 = vor.u32 %v2991_v40, %v2647_v3  ;;  %v2642_v47 = vor.u32 %v2989_v10, %v2639_v53  ;;  %v2981_v62 = vld [vmem:[#allocation5 + $0x494] sm:$0xf]  ;;  %v3658_v10 = vld [vmem:[#allocation7 + $0x3] ss:$8 sm:$0x3] }
 0x113   :  { %v1014_v27 = vmul.f32 %v3527_v28, %v1000_v21  ;;  %2816 = vmatmul.msk.bf16.gmra.mxu2 %vm3288_vm5, %v3550_v51  ;;  %1832 = vmatpush.bf16.msrb.mxu0 %v2538_v12  ;;  %v2759_v28 = vld [vmem:[#allocation5 + $0x5c8] sm:$0xf0]  ;;  %v2803_v21 = vpack.c.bf16 %v1171_v46, %v1165_v52  ;;  %v1144_v12 = vsel %vm240_vm0, %v1136_v31, %v1138_v11  ;;  %v1162_v31 = vrot.slane %v3583_v38, 1 }
 0x114   :  { %1884 = vmatpush.bf16.msrb.mxu3 %v2770_v16  ;;  %v2762_v51 = vor.u32 %v3019_v43, %v2759_v28  ;;  %v2634_v16 = vor.u32 %v2987_v24, %v2631_v18  ;;  %v2610_v43 = vor.u32 %v2981_v62, %v2607_v2  ;;  %v2979_v28 = vld [vmem:[#allocation5 + $0x484] sm:$0xf]  ;;  %v1915_v34 = vperm.slane %v3658_v10, 0 }
 0x115   :  { %v1027_v59 = vadd.f32 %v3530_v63, %v1014_v27  ;;  %v2726_v63 = vor.u32 %v3012_v1, %v2725_v6  ;;  %v2985_v27 = vld [vmem:[#allocation5 + $0x4b4] sm:$0xf]  ;;  %v1160_v6 = vrot.slane %v3556_v45, 1 }
 0x116   :  { %2801 = vmatmul.msk.bf16.vlgmr.msra.gmra.mxu0 %vm3345_vm8, %v2800_v36  ;;  %v2626_v32 = vor.u32 %v2985_v27, %v2623_v55 }
 0x117   :  { %v3585_v5 = vmax.f32 %v1027_v59, 0.0  ;;  %1775 = vmatpush.bf16.msra.mxu1 %v2726_v63  ;;  %v2615_v59 = vld [vmem:[#allocation5 + $0x4a8] sm:$0xf0]  ;;  %v1158_v63 = vrot.slane %v3554_v61, 1 }
 0x118   :  { %1885 = vmatpush.bf16.msrb.mxu3 %v2762_v51  ;;  %v2599_v51 = vld [vmem:[#allocation5 + $0x488] sm:$0xf0] }
 0x119   :  { %v1140_v0 = vrot.slane %v3585_v5, 7  ;;  %v3593_v33 = vpack.c.bf16 %v3585_v5, %v3583_v38  ;;  %v2602_v1 = vor.u32 %v2979_v28, %v2599_v51 }
 0x11b   :  { %1743 = vmatmul.bf16.gmra.mxu3 %v3593_v33  ;;  %v1148_v17 = vsel %vm240_vm0, %v1140_v0, %v1134_v56  ;;  %v1142_v49 = vsel %vm240_vm0, %v1138_v11, %v1140_v0  ;;  %v1168_v56 = vsel %vm265_vm6, %v1160_v6, %v1162_v31  ;;  %v1170_v0 = vsel %vm265_vm6, %v1158_v63, %v1160_v6  ;;  %v3037_v6 = vld [vmem:[#allocation2 + $0x10] sm:$0xff] }
 0x11c   :  { %v2794_v30 = vpack.c.bf16 %v1146_v23, %v1148_v17  ;;  %1886 = vmatpush.bf16.msrb.mxu3 %v2754_v22  ;;  %v2797_v35 = vpack.c.bf16 %v1142_v49, %v1144_v12  ;;  %v2806_v38 = vpack.c.bf16 %v1168_v56, %v1170_v0  ;;  %v3036_v12 = vld [vmem:[#allocation2] sm:$0xff] }
 0x11e   :  { %2795 = vmatmul.msk.bf16.vlgmr.msrb.gmra.mxu1 %vm3234_vm3, %v2794_v30 }
 0x11f   :  { %1844 = vmatpush.bf16.msrb.mxu1 %v2658_v26 }
 0x120   :  { %1887 = vmatpush.bf16.msrb.mxu3 %v2746_v42 }
 0x123   :  { %2825 = vmatmul.msk.bf16.vlgmr.msrb.gmra.mxu2 %vm3345_vm8, %v2800_v36  ;;  %1845 = vmatpush.bf16.msrb.mxu1 %v2650_v44  ;;  %v2618_v36 = vor.u32 %v2983_v20, %v2615_v59  ;;  %v3654_v44 = vld [vmem:[#allocation7 + $0x2] ss:$8 sm:$0x3] }
 0x124   :  { %1888 = vmatpush.bf16.msrb.mxu3 %v2738_v58  ;;  %v1902_v46 = vperm.slane %v3654_v44, 0 }
 0x126   :  { %2804 = vmatmul.msk.bf16.gmra.mxu0 %vm3387_vm10, %v2803_v21 }
 0x127   :  { %1846 = vmatpush.bf16.msrb.mxu1 %v2642_v47 }
 0x128   :  { %1889 = vmatpush.bf16.msrb.mxu3 %v2730_v48 }
 0x12b   :  { %2819 = vmatmul.msk.bf16.vlgmr.msra.gmra.mxu3 %vm3234_vm3, %v2794_v30  ;;  %1847 = vmatpush.bf16.msrb.mxu1 %v2634_v16 }
 0x12e   :  { %2798 = vmatmul.msk.bf16.gmra.mxu1 %vm3288_vm5, %v2797_v35 }
 0x12f   :  { %1848 = vmatpush.bf16.msrb.mxu1 %v2626_v32 }
 0x133   :  { %2828 = vmatmul.msk.bf16.gmra.mxu2 %vm3387_vm10, %v2803_v21  ;;  %1849 = vmatpush.bf16.msrb.mxu1 %v2618_v36 }
 0x136   :  { %1833 = vmatmul.bf16.vlgmr.msrb.gmra.mxu0 %v3481_v41  ;;  %v1164_v41 = vrot.slane %v3585_v5, 1 }
 0x137   :  { %1850 = vmatpush.bf16.msrb.mxu1 %v2610_v43 }
 0x138   :  { %v1166_v61 = vsel %vm265_vm6, %v1162_v31, %v1164_v41  ;;  %v1172_v45 = vsel %vm265_vm6, %v1164_v41, %v1158_v63 }
 0x139   :  { %v2809_v39 = vpack.c.bf16 %v1172_v45, %v1166_v61 }
 0x13b   :  { %2822 = vmatmul.msk.bf16.gmra.mxu3 %vm3288_vm5, %v2797_v35  ;;  %1851 = vmatpush.bf16.msrb.mxu1 %v2602_v1 }
 0x13e   :  { %2807 = vmatmul.msk.bf16.vlgmr.msra.gmra.mxu1 %vm3345_vm8, %v2806_v38 }
 0x146   :  { %1838 = vmatmul.bf16.gmra.mxu0 %v3508_v14 }
 0x14b   :  { %2831 = vmatmul.msk.bf16.vlgmr.msrb.gmra.mxu3 %vm3345_vm8, %v2806_v38 }
 0x14e   :  { %2810 = vmatmul.msk.bf16.gmra.mxu1 %vm3387_vm10, %v2809_v39 }
 0x15b   :  { %2834 = vmatmul.msk.bf16.gmra.mxu3 %vm3387_vm10, %v2809_v39 }
 0x15e   :  { %1852 = vmatmul.bf16.vlgmr.msrb.gmra.mxu1 %v3563_v19 }
 0x166   :  { %v1720_v5 = vpop.f32.mrf.mxu2 }
 0x16e   :  { %1857 = vmatmul.bf16.gmra.mxu1 %v3593_v33  ;;  %v1722_v60 = vpop.f32.mrf.mxu2 }
 0x173   :  { %v1682_v14 = vpop.f32.mrf.mxu0 }
 0x176   :  { %v1725_v57 = vpop.f32.mrf.mxu2 }
 0x17b   :  { %v1684_v13 = vpop.f32.mrf.mxu0 }
 0x17e   :  { %v1727_v54 = vpop.f32.mrf.mxu2 }
 0x183   :  { %v1687_v23 = vpop.f32.mrf.mxu0 }
 0x186   :  { %v1796_v19 = vpop.f32.mrf.mxu2 }
 0x18b   :  { %v1689_v25 = vpop.f32.mrf.mxu0 }
 0x18e   :  { %v1739_v15 = vpop.f32.mrf.mxu3  ;;  %v3656_v58 = vpop.f32.mrf.mxu2 }
 0x193   :  { %v1758_v9 = vpop.f32.mrf.mxu0 }
 0x196   :  { %v1741_v17 = vpop.f32.mrf.mxu3  ;;  %v1801_v55 = vpop.f32.mrf.mxu2 }
 0x19b   :  { %v1701_v22 = vpop.f32.mrf.mxu1  ;;  %v1760_v42 = vpop.f32.mrf.mxu0 }
 0x19c   :  { %v1702_v37 = vadd.f32 %v1701_v22, %v1682_v14 }
 0x19e   :  { %v1744_v30 = vpop.f32.mrf.mxu3  ;;  %v1721_v33 = vadd.f32 %v1720_v5, %v1702_v37  ;;  %v1803_v41 = vpop.f32.mrf.mxu2 }
 0x1a0   :  { %v1740_v7 = vadd.f32 %v1739_v15, %v1721_v33 }
 0x1a2   :  { %v1759_v52 = vadd.f32 %v1758_v9, %v1740_v7 }
 0x1a3   :  { %v1703_v50 = vpop.f32.mrf.mxu1  ;;  %v1763_v11 = vpop.f32.mrf.mxu0 }
 0x1a4   :  { %v1704_v4 = vadd.f32 %v1703_v50, %v1684_v13  ;;  %v3038_v13 = vld [vmem:[#allocation2 + $0x20] sm:$0xff] }
 0x1a6   :  { %v1746_v26 = vpop.f32.mrf.mxu3  ;;  %v1723_v53 = vadd.f32 %v1722_v60, %v1704_v4  ;;  %v1903_v4 = vperm.slane %v3654_v44, 1 }
 0x1a8   :  { %v1742_v18 = vadd.f32 %v1741_v17, %v1723_v53 }
 0x1aa   :  { %v1761_v27 = vadd.f32 %v1760_v42, %v1742_v18  ;;  %v3040_v18 = vld [vmem:[#allocation2 + $0x8] sm:$0xff] }
 0x1ab   :  { %v1706_v8 = vpop.f32.mrf.mxu1  ;;  %v1765_v31 = vpop.f32.mrf.mxu0 }
 0x1ac   :  { %v1707_v48 = vadd.f32 %v1706_v8, %v1687_v23  ;;  %v3039_v8 = vld [vmem:[#allocation2 + $0x30] sm:$0xff] }
 0x1ae   :  { %v1815_v40 = vpop.f32.mrf.mxu3  ;;  %v1726_v49 = vadd.f32 %v1725_v57, %v1707_v48 }
 0x1b0   :  { %v1745_v43 = vadd.f32 %v1744_v30, %v1726_v49  ;;  %v1872_v30 = vpop.f32.mrf.mxu2 }
 0x1b2   :  { %v1764_v63 = vadd.f32 %v1763_v11, %v1745_v43 }
 0x1b3   :  { %v1708_v3 = vpop.f32.mrf.mxu1  ;;  %v1834_v5 = vpop.f32.mrf.mxu0 }
 0x1b4   :  { %v1709_v62 = vadd.f32 %v1708_v3, %v1689_v25  ;;  %v1816_v25 = vadd.f32 %v1815_v40, %v1796_v19 }
 0x1b6   :  { %v1817_v47 = vpop.f32.mrf.mxu3  ;;  %v1728_v51 = vadd.f32 %v1727_v54, %v1709_v62  ;;  %v1835_v9 = vadd.f32 %v1834_v5, %v1816_v25  ;;  %v3041_v62 = vld [vmem:[#allocation2 + $0x18] sm:$0xff] }
 0x1b7   :  { %v1818_v53 = vadd.f32 %v1817_v47, %v3656_v58 }
 0x1b8   :  { %v1747_v45 = vadd.f32 %v1746_v26, %v1728_v51 }
 0x1ba   :  { %v1766_v60 = vadd.f32 %v1765_v31, %v1747_v45 }
 0x1bb   :  { %v1777_v21 = vpop.f32.mrf.mxu1  ;;  %v1836_v33 = vpop.f32.mrf.mxu0 }
 0x1bc   :  { %v1778_v29 = vadd.f32 %v1777_v21, %v1759_v52  ;;  %v1916_v52 = vperm.slane %v3658_v10, 1  ;;  %v1874_v21 = vpop.f32.mrf.mxu2  ;;  %v1837_v19 = vadd.f32 %v1836_v33, %v1818_v53 }
 0x1be   :  { %v1906_v24 = vmul.f32 %v1902_v46, %v1778_v29  ;;  %v1820_v36 = vpop.f32.mrf.mxu3 }
 0x1c0   :  { %v1919_v16 = vadd.f32 %v1915_v34, %v1906_v24 }
 0x1c2   :  { %v1927_v35 = vadd.f32 %v3036_v12, %v1919_v16  ;;  %v1821_v12 = vadd.f32 %v1820_v36, %v1801_v55 }
 0x1c3   :  { %v1779_v32 = vpop.f32.mrf.mxu1  ;;  %v1839_v24 = vpop.f32.mrf.mxu0 }
 0x1c4   :  { %v1935_v20 = vmax.f32 %v1927_v35, 0.0  ;;  %v1780_v59 = vadd.f32 %v1779_v32, %v1761_v27  ;;  %v1840_v27 = vadd.f32 %v1839_v24, %v1821_v12  ;;  %v1877_v47 = vpop.f32.mrf.mxu2 }
 0x1c6   :  { %1943 = vst [vmem:[#allocation8] sm:$0xff] %v1935_v20  ;;  %v1908_v2 = vmul.f32 %v1902_v46, %v1780_v59  ;;  %v1822_v39 = vpop.f32.mrf.mxu3 }
 0x1c8   :  { %v1921_v28 = vadd.f32 %v1915_v34, %v1908_v2 }
 0x1ca   :  { %v1929_v1 = vadd.f32 %v3037_v6, %v1921_v28  ;;  %v1823_v28 = vadd.f32 %v1822_v39, %v1803_v41  ;;  %v3043_v41 = vld [vmem:[#allocation2 + $0x38] sm:$0xff] }
 0x1cb   :  { %v1782_v56 = vpop.f32.mrf.mxu1  ;;  %v1841_v31 = vpop.f32.mrf.mxu0 }
 0x1cc   :  { %v1937_v0 = vmax.f32 %v1929_v1, 0.0  ;;  %v1783_v38 = vadd.f32 %v1782_v56, %v1764_v63  ;;  %v1842_v1 = vadd.f32 %v1841_v31, %v1823_v28 }
 0x1ce   :  { %1945 = vst [vmem:[#allocation8 + $0x10] sm:$0xff] %v1937_v0  ;;  %v1910_v61 = vmul.f32 %v1902_v46, %v1783_v38  ;;  %v1891_v54 = vpop.f32.mrf.mxu3  ;;  %v1879_v0 = vpop.f32.mrf.mxu2  ;;  %v3042_v38 = vld [vmem:[#allocation2 + $0x28] sm:$0xff] }
 0x1d0   :  { %v1923_v14 = vadd.f32 %v1915_v34, %v1910_v61 }
 0x1d2   :  { %v1931_v15 = vadd.f32 %v3038_v13, %v1923_v14 }
 0x1d3   :  { %v1784_v23 = vpop.f32.mrf.mxu1 }
 0x1d4   :  { %v1939_v17 = vmax.f32 %v1931_v15, 0.0  ;;  %v1785_v57 = vadd.f32 %v1784_v23, %v1766_v60 }
 0x1d6   :  { %1947 = vst [vmem:[#allocation8 + $0x20] sm:$0xff] %v1939_v17  ;;  %v1912_v22 = vmul.f32 %v1902_v46, %v1785_v57  ;;  %v1893_v29 = vpop.f32.mrf.mxu3 }
 0x1d8   :  { %v1925_v50 = vadd.f32 %v1915_v34, %v1912_v22 }
 0x1da   :  { %v1933_v37 = vadd.f32 %v3039_v8, %v1925_v50 }
 0x1db   :  { %v1853_v26 = vpop.f32.mrf.mxu1 }
 0x1dc   :  { %v1941_v42 = vmax.f32 %v1933_v37, 0.0  ;;  %v1854_v3 = vadd.f32 %v1853_v26, %v1835_v9 }
 0x1de   :  { %1949 = vst [vmem:[#allocation8 + $0x30] sm:$0xff] %v1941_v42  ;;  %v1873_v7 = vadd.f32 %v1872_v30, %v1854_v3  ;;  %v1896_v59 = vpop.f32.mrf.mxu3 }
 0x1e0   :  { %v1892_v46 = vadd.f32 %v1891_v54, %v1873_v7 }
 0x1e2   :  { %v1907_v40 = vmul.f32 %v1903_v4, %v1892_v46 }
 0x1e3   :  { %v1855_v34 = vpop.f32.mrf.mxu1 }
 0x1e4   :  { %v1920_v11 = vadd.f32 %v1916_v52, %v1907_v40  ;;  %v1856_v48 = vadd.f32 %v1855_v34, %v1837_v19 }
 0x1e6   :  { %v1928_v16 = vadd.f32 %v3040_v18, %v1920_v11  ;;  %v1875_v49 = vadd.f32 %v1874_v21, %v1856_v48  ;;  %v1898_v14 = vpop.f32.mrf.mxu3 }
 0x1e8   :  { %v1936_v44 = vmax.f32 %v1928_v16, 0.0  ;;  %v1894_v35 = vadd.f32 %v1893_v29, %v1875_v49 }
 0x1ea   :  { %1944 = vst [vmem:[#allocation8 + $0x8] sm:$0xff] %v1936_v44  ;;  %v1909_v58 = vmul.f32 %v1903_v4, %v1894_v35 }
 0x1eb   :  { %v1858_v10 = vpop.f32.mrf.mxu1 }
 0x1ec   :  { %v1922_v32 = vadd.f32 %v1916_v52, %v1909_v58  ;;  %v1859_v20 = vadd.f32 %v1858_v10, %v1840_v27 }
 0x1ee   :  { %v1930_v2 = vadd.f32 %v3041_v62, %v1922_v32  ;;  %v1878_v43 = vadd.f32 %v1877_v47, %v1859_v20 }
 0x1f0   :  { %v1938_v51 = vmax.f32 %v1930_v2, 0.0  ;;  %v1897_v6 = vadd.f32 %v1896_v59, %v1878_v43 }
 0x1f2   :  { %1946 = vst [vmem:[#allocation8 + $0x18] sm:$0xff] %v1938_v51  ;;  %v1911_v55 = vmul.f32 %v1903_v4, %v1897_v6 }
 0x1f3   :  { %v1860_v36 = vpop.f32.mrf.mxu1 }
 0x1f4   :  { %v1924_v63 = vadd.f32 %v1916_v52, %v1911_v55  ;;  %v1861_v56 = vadd.f32 %v1860_v36, %v1842_v1 }
 0x1f6   :  { %v1932_v61 = vadd.f32 %v3042_v38, %v1924_v63  ;;  %v1880_v45 = vadd.f32 %v1879_v0, %v1861_v56 }
 0x1f8   :  { %v1940_v5 = vmax.f32 %v1932_v61, 0.0  ;;  %v1899_v13 = vadd.f32 %v1898_v14, %v1880_v45 }
 0x1fa   :  { %1948 = vst [vmem:[#allocation8 + $0x28] sm:$0xff] %v1940_v5  ;;  %v1913_v15 = vmul.f32 %v1903_v4, %v1899_v13 }
 0x1fc   :  { %v1926_v60 = vadd.f32 %v1916_v52, %v1913_v15 }
 0x1fe   :  { %v1934_v39 = vadd.f32 %v3043_v41, %v1926_v60 }
 0x200   :  { %v1942_v23 = vmax.f32 %v1934_v39, 0.0 }
 0x202   :  { %1950 = vst [vmem:[#allocation8 + $0x38] sm:$0xff] %v1942_v23 }
 0x203   :  { %1963 = dma.vmem_to_hbm [thread:$0]  %s1956_s29, 1024, %s1958_s5, [#allocation4], %s3150_s24, %s3150_s24, %s3151_s25  }
 0x204   :  { %3144 = dma.done.wait [#allocation4], 1024  }
 0x205   :  { %3145 = vsyncadd [#allocation4], 4294966272 }
 0x206   :  { %1968 = vsyncpa [#allocation3], 1 }
 0x207   :  { %1969 = vsyncpa [#allocation6], 1 }
 0x208   :  { %1970 = vsyncpa [#allocation4], 1 }

</bundles_post_ra>
